<compile_context>
chip_gen: v6e
topology: v6e:2x2x1
jax: 0.10.0
libtpu: 0.0.40
codegen_flags: <defaults>
</compile_context>

<pallas_src>
import numpy as np
import jax
import jax.numpy as jnp
from jax.experimental import pallas as pl
from jax.experimental.pallas import tpu as pltpu

# ----------------- module configuration (small, consistent with __init__) -----------------
B = 2                       # batch
NINP = 32                   # ninp
NHID = 32                   # n_hid
NUM_BLOCKS_IN = 1           # must be 1 for write-count to match num_modules_read_input
NUM_BLOCKS_OUT = 4
TOPKVAL = 3
NUM_MODULES_READ_INPUT = 2
BLOCK_SIZE_OUT = NHID // NUM_BLOCKS_OUT          # 8
ATT_OUT = BLOCK_SIZE_OUT * 4                     # 32
D_K_INP = 64                                     # inp_att d_k (1 head)
N_HEAD_COMM = 4
D_K_COMM = 16
D_V_COMM = 16
GRU_IN = ATT_OUT * NUM_BLOCKS_OUT                # 128
CH = N_HEAD_COMM * D_K_COMM                      # 64 = comm q/k/v width per block
SEG = NUM_BLOCKS_OUT * CH                        # 256 = Q_all / K_all / V_all width


def _blocks_core_kernel(inp_ref, hx_ref,
                        wq_i_ref, wkv_i_ref, rq_ref, e32_ref, e8_ref,
                        w_gru_ref, b_gru_ref,
                        w_qkv_ref, r64_ref, ea_ref, w_fg_ref, b_fg_ref,
                        hx_out_ref, mask_out_ref):
    f32 = jnp.float32
    bf16 = jnp.bfloat16
    hx = hx_ref[...].astype(f32)                 # (B, NHID)
    inp_bf = inp_ref[...].astype(bf16)           # (B, NINP)
    hx_bf = hx.astype(bf16)
    bsz = hx.shape[0]

    # ------------------------- input attention (inp_att) -------------------------
    # write set = [zeros, inp]; the null block has zero key/value, so softmax over
    # [0, s] == sigmoid(s) on the inp score, and the output is attn_inp * (inp @ Wv).
    q_i = jnp.dot(hx_bf, wq_i_ref[...], preferred_element_type=f32)       # (B, NB*64), 1/sqrt(dk) folded
    kv_i = jnp.dot(inp_bf, wkv_i_ref[...], preferred_element_type=f32)    # (B, 64 + 32)
    k_i = kv_i[:, :D_K_INP]                                               # (B, 64)
    v_i = kv_i[:, D_K_INP:]                                               # (B, ATT_OUT)

    k_t = jnp.concatenate([k_i] * NUM_BLOCKS_OUT, axis=1)                 # (B, 256)
    s_i = jnp.dot((q_i * k_t).astype(bf16), rq_ref[...],
                  preferred_element_type=f32)                             # (B, NB) per-block score
    attn_inp = jax.nn.sigmoid(s_i)                                        # (B, NB) = softmax([0,s])[1]

    a_exp = jnp.dot(attn_inp.astype(bf16), e32_ref[...],
                    preferred_element_type=f32)                           # (B, NB*ATT_OUT)
    v_t = jnp.concatenate([v_i] * NUM_BLOCKS_OUT, axis=1)                 # (B, 128)
    inp_use = a_exp * v_t                                                 # (B, 128) skip_write -> no fc

    # ------------------------- top-k block mask -------------------------
    # drop the (NB - topkval) blocks with LARGEST attention to null == SMALLEST attn_inp;
    # ties resolved lower-index-first (torch.topk behaviour).
    num_drop = NUM_BLOCKS_OUT - TOPKVAL
    col_ids = jax.lax.broadcasted_iota(jnp.int32, (bsz, NUM_BLOCKS_OUT), 1)
    rank = jnp.zeros((bsz, NUM_BLOCKS_OUT), f32)
    for i in range(NUM_BLOCKS_OUT):
        a_i = attn_inp[:, i:i + 1]
        cmp = (a_i < attn_inp) | ((a_i == attn_inp) & (col_ids > i))
        rank = rank + cmp.astype(f32)
    keep = (rank >= num_drop).astype(f32)                                 # (B, NB) 1 = keep block
    mask_full = jnp.dot(keep.astype(bf16), e8_ref[...],
                        preferred_element_type=f32)                       # (B, NHID) exact 0/1

    # ------------------------- BlockGRU (nn.GRUCell math, fused matmul) -------------------------
    x_cat = jnp.concatenate([inp_use, hx], axis=1).astype(bf16)           # (B, 160)
    gates = jnp.dot(x_cat, w_gru_ref[...], preferred_element_type=f32) + b_gru_ref[...]  # (B, 192)
    gi_rz = gates[:, 0:2 * NHID]
    i_n = gates[:, 2 * NHID:3 * NHID]
    gh_rz = gates[:, 3 * NHID:5 * NHID]
    h_n = gates[:, 5 * NHID:6 * NHID]
    rz = jax.nn.sigmoid(gi_rz + gh_rz)
    r = rz[:, :NHID]
    z = rz[:, NHID:]
    n_gate = jnp.tanh(i_n + r * h_n)
    h_new = (1.0 - z) * n_gate + z * hx                                   # (B, NHID)

    # ------------------------- communication attention (mha, 4 heads over blocks) ---------------
    qkv = jnp.dot(h_new.astype(bf16), w_qkv_ref[...], preferred_element_type=f32)  # (B, 768)
    q_c = qkv[:, 0:SEG]                  # (B, 256)  col = n*64 + h*16 + d, 1/sqrt(dk) folded
    k_c = qkv[:, SEG:2 * SEG]            # (B, 256)
    v_c = qkv[:, 2 * SEG:]               # (B, 256)

    # scores s_m[b, n*4 + h] = sum_d q[n,h,d] * k[m,h,d]
    s_list = []
    for m in range(NUM_BLOCKS_OUT):
        k_m = k_c[:, m * CH:(m + 1) * CH]
        k_m_t = jnp.concatenate([k_m] * NUM_BLOCKS_OUT, axis=1)           # (B, 256)
        s_list.append(jnp.dot((q_c * k_m_t).astype(bf16), r64_ref[...],
                              preferred_element_type=f32))                # (B, 16)

    # grouped softmax over the key-block axis m (per (n, h) group)
    s_max = s_list[0]
    for s in s_list[1:]:
        s_max = jnp.maximum(s_max, s)
    e_list = [jnp.exp(s - s_max) for s in s_list]
    denom = e_list[0]
    for e in e_list[1:]:
        denom = denom + e
    r_denom = pl.reciprocal(denom, approx=True)                           # (B, 16)

    # weighted sum over key blocks: o_flat[b, n*64 + h*16 + d] = sum_m attn[n,h,m] * v[m,h,d]
    o_flat = jnp.zeros((bsz, SEG), f32)
    for m in range(NUM_BLOCKS_OUT):
        attn_m = (e_list[m] * r_denom).astype(bf16)                       # (B, 16)
        a_e = jnp.dot(attn_m, ea_ref[...], preferred_element_type=f32)    # (B, 256)
        v_m = v_c[:, m * CH:(m + 1) * CH]
        v_m_t = jnp.concatenate([v_m] * NUM_BLOCKS_OUT, axis=1)           # (B, 256)
        o_flat = o_flat + a_e * v_m_t

    # per-block fc | gate_fc (shared Linear(64 -> 8)), residual gating
    fg = jnp.dot(o_flat.astype(bf16), w_fg_ref[...], preferred_element_type=f32) + b_fg_ref[...]  # (B, 64)
    att = jax.nn.sigmoid(fg[:, NHID:]) * jnp.tanh(fg[:, :NHID])           # (B, 32)
    hx_new = h_new + att                                                  # hx_new = hx_new + hx_new_att

    # ------------------------- final gating with the block mask -------------------------
    hx_out_ref[...] = (mask_full * hx_new + (1.0 - mask_full) * hx).astype(hx_out_ref.dtype)
    mask_out_ref[...] = mask_full.astype(mask_out_ref.dtype)


def blocks_core_forward(fused, inp, hx):
    """hx is a tuple of length 1, mirroring the PyTorch signature."""
    assert len(hx) == 1
    hx0 = hx[0]
    args = (inp, hx0,
            fused["wq_i"], fused["wkv_i"], fused["rq"], fused["e32"], fused["e8"],
            fused["w_gru"], fused["b_gru"],
            fused["w_qkv"], fused["r64"], fused["ea"], fused["w_fg"], fused["b_fg"])
    out_shape = (jax.ShapeDtypeStruct((inp.shape[0], NHID), jnp.float32),
                 jax.ShapeDtypeStruct((inp.shape[0], NHID), jnp.float32))
    return pl.pallas_call(
        _blocks_core_kernel,
        out_shape=out_shape,
        in_specs=[pl.BlockSpec(memory_space=pltpu.MemorySpace.VMEM)] * len(args),
        out_specs=tuple(pl.BlockSpec(memory_space=pltpu.MemorySpace.VMEM) for _ in range(2)),
    )(*args)


def init_params(key):
    """Per-module parameters, mirroring the PyTorch initializers."""
    ks = jax.random.split(key, 16)
    u = lambda k, shape, bound: jax.random.uniform(k, shape, jnp.float32, -bound, bound)
    n = lambda k, shape: 0.01 * jax.random.normal(k, shape, jnp.float32)   # GroupLinearLayer init
    lin_bound = 1.0 / jnp.sqrt(jnp.float32(N_HEAD_COMM * D_V_COMM))        # nn.Linear(64, BS)
    gru_bound = 1.0 / jnp.sqrt(jnp.float32(NHID))
    return {
        # input attention (GroupLinearLayers, no bias)
        "wq_i": n(ks[0], (NUM_BLOCKS_OUT, BLOCK_SIZE_OUT, D_K_INP)),
        "wk_i": n(ks[1], (NUM_MODULES_READ_INPUT, NINP, D_K_INP)),
        "wv_i": n(ks[2], (NUM_MODULES_READ_INPUT, NINP, ATT_OUT)),
        # communication attention
        "wq_c": n(ks[3], (NUM_BLOCKS_OUT, BLOCK_SIZE_OUT, N_HEAD_COMM * D_K_COMM)),
        "wk_c": n(ks[4], (NUM_BLOCKS_OUT, BLOCK_SIZE_OUT, N_HEAD_COMM * D_K_COMM)),
        "wv_c": n(ks[5], (NUM_BLOCKS_OUT, BLOCK_SIZE_OUT, N_HEAD_COMM * D_V_COMM)),
        # fc / gate_fc of the comm attention (stored pre-transposed: [in, out])
        "fc_w_t": u(ks[6], (N_HEAD_COMM * D_V_COMM, BLOCK_SIZE_OUT), lin_bound),
        "fc_b": u(ks[7], (1, BLOCK_SIZE_OUT), lin_bound),
        "gate_w_t": u(ks[8], (N_HEAD_COMM * D_V_COMM, BLOCK_SIZE_OUT), lin_bound),
        "gate_b": u(ks[9], (1, BLOCK_SIZE_OUT), lin_bound),
        # GRUCell (weights pre-transposed: [in, 3*NHID]); gate order [r, z, n]
        "w_ih_t": u(ks[10], (GRU_IN, 3 * NHID), gru_bound),
        "w_hh_t": u(ks[11], (NHID, 3 * NHID), gru_bound),
        "b_ih": u(ks[12], (1, 3 * NHID), gru_bound),
        "b_hh": u(ks[13], (1, 3 * NHID), gru_bound),
    }


def fuse_params(p):
    """Host-side fusion: block-diagonal / concatenated weights + tiny 0/1 reduce/expand mats."""
    f32 = jnp.float32
    bf16 = jnp.bfloat16
    temp_i = float(np.sqrt(D_K_INP))
    temp_c = float(np.sqrt(D_K_COMM))

    def block_diag(w):                               # (nb, di, do) -> (nb*di, nb*do)
        nb, di, do = w.shape
        m = jnp.zeros((nb * di, nb * do), w.dtype)
        for i in range(nb):
            m = m.at[i * di:(i + 1) * di, i * do:(i + 1) * do].set(w[i])
        return m

    # input attention: fused per-block q projection (scale folded), fused k|v projection
    wq_i = block_diag(p["wq_i"] / temp_i)                                       # (32, 256)
    wkv_i = jnp.concatenate([p["wk_i"][1], p["wv_i"][1]], axis=1)               # (32, 96)

    # comm attention: block-diagonal fused q|k|v, laid out as [Q_all | K_all | V_all]
    w_qkv = jnp.zeros((NHID, 3 * SEG), f32)
    for n_blk in range(NUM_BLOCKS_OUT):
        r0 = n_blk * BLOCK_SIZE_OUT
        c0 = n_blk * CH
        w_qkv = w_qkv.at[r0:r0 + BLOCK_SIZE_OUT, c0:c0 + CH].set(p["wq_c"][n_blk] / temp_c)
        w_qkv = w_qkv.at[r0:r0 + BLOCK_SIZE_OUT, SEG + c0:SEG + c0 + CH].set(p["wk_c"][n_blk])
        w_qkv = w_qkv.at[r0:r0 + BLOCK_SIZE_OUT, 2 * SEG + c0:2 * SEG + c0 + CH].set(p["wv_c"][n_blk])

    # fused GRU weight: [x | h] @ W -> [gi(96) | gh(96)]
    w_gru = jnp.zeros((GRU_IN + NHID, 6 * NHID), f32)
    w_gru = w_gru.at[:GRU_IN, :3 * NHID].set(p["w_ih_t"])
    w_gru = w_gru.at[GRU_IN:, 3 * NHID:].set(p["w_hh_t"])
    b_gru = jnp.concatenate([p["b_ih"], p["b_hh"]], axis=1)                     # (1, 192)

    # per-block (shared) fc | gate applied on the (B, 256) head-concat output
    eye_nb = jnp.eye(NUM_BLOCKS_OUT, dtype=f32)
    w_fg = jnp.concatenate([jnp.kron(eye_nb, p["fc_w_t"]),
                            jnp.kron(eye_nb, p["gate_w_t"])], axis=1)           # (256, 64)
    b_fg = jnp.concatenate([jnp.tile(p["fc_b"], (1, NUM_BLOCKS_OUT)),
                            jnp.tile(p["gate_b"], (1, NUM_BLOCKS_OUT))], axis=1)  # (1, 64)

    # constant 0/1 reduce / expand matrices (exact in bf16)
    rq = np.kron(np.eye(NUM_BLOCKS_OUT), np.ones((D_K_INP, 1)))                 # (256, 4)
    e32 = np.kron(np.eye(NUM_BLOCKS_OUT), np.ones((1, ATT_OUT)))                # (4, 128)
    e8 = np.kron(np.eye(NUM_BLOCKS_OUT), np.ones((1, BLOCK_SIZE_OUT)))          # (4, 32)
    r64 = np.kron(np.eye(NUM_BLOCKS_OUT),
                  np.kron(np.eye(N_HEAD_COMM), np.ones((D_K_COMM, 1))))         # (256, 16)
    ea = r64.T                                                                  # (16, 256)

    return {
        "wq_i": wq_i.astype(bf16), "wkv_i": wkv_i.astype(bf16),
        "rq": jnp.asarray(rq, bf16), "e32": jnp.asarray(e32, bf16), "e8": jnp.asarray(e8, bf16),
        "w_gru": w_gru.astype(bf16), "b_gru": b_gru.astype(f32),
        "w_qkv": w_qkv.astype(bf16), "r64": jnp.asarray(r64, bf16), "ea": jnp.asarray(ea, bf16),
        "w_fg": w_fg.astype(bf16), "b_fg": b_fg.astype(f32),
    }


if __name__ == "__main__":
    key = jax.random.PRNGKey(0)
    k_p, k_inp, k_hx = jax.random.split(key, 3)
    params = init_params(k_p)
    fused = fuse_params(params)

    inp = jax.random.normal(k_inp, (B, NUM_BLOCKS_IN * NINP), jnp.float32)   # (2, 32)
    hx = (jax.random.normal(k_hx, (B, NHID), jnp.float32),)                  # tuple of one, (2, 32)

    hx_out, mask = blocks_core_forward(fused, inp, hx)
    hx_out, mask = jax.block_until_ready((hx_out, mask))

    # mirror the reference assertion: each row keeps exactly `topkval` blocks
    per_row_blocks = mask.sum(axis=1) / BLOCK_SIZE_OUT
    assert bool(jnp.all(per_row_blocks == TOPKVAL)), per_row_blocks
    assert hx_out.shape == (B, NHID) and mask.shape == (B, NHID)

    print("KERNEL_OK")
</pallas_src>

<mosaic_0001>
module attributes {stable_mosaic.version = 11 : i64} {
  func.func @_blocks_core_kernel(%arg0: memref<2x32xf32, #tpu.memory_space<vmem>>, %arg1: memref<2x32xf32, #tpu.memory_space<vmem>>, %arg2: memref<32x256xbf16, #tpu.memory_space<vmem>>, %arg3: memref<32x96xbf16, #tpu.memory_space<vmem>>, %arg4: memref<256x4xbf16, #tpu.memory_space<vmem>>, %arg5: memref<4x128xbf16, #tpu.memory_space<vmem>>, %arg6: memref<4x32xbf16, #tpu.memory_space<vmem>>, %arg7: memref<160x192xbf16, #tpu.memory_space<vmem>>, %arg8: memref<1x192xf32, #tpu.memory_space<vmem>>, %arg9: memref<32x768xbf16, #tpu.memory_space<vmem>>, %arg10: memref<256x16xbf16, #tpu.memory_space<vmem>>, %arg11: memref<16x256xbf16, #tpu.memory_space<vmem>>, %arg12: memref<256x64xbf16, #tpu.memory_space<vmem>>, %arg13: memref<1x64xf32, #tpu.memory_space<vmem>>, %arg14: memref<2x32xf32, #tpu.memory_space<vmem>>, %arg15: memref<2x32xf32, #tpu.memory_space<vmem>>) attributes {dimension_semantics = [], scalar_prefetch = 0 : i64, scratch_operands = 0 : i64, tpu.core_type = #tpu.core_type<tc>} {
    %c0 = arith.constant 0 : index
    %c0_0 = arith.constant 0 : index
    %0 = vector.load %arg1[%c0, %c0_0] : memref<2x32xf32, #tpu.memory_space<vmem>>, vector<2x32xf32>
    %c0_1 = arith.constant 0 : index
    %c0_2 = arith.constant 0 : index
    %1 = vector.load %arg0[%c0_1, %c0_2] : memref<2x32xf32, #tpu.memory_space<vmem>>, vector<2x32xf32>
    %2 = arith.truncf %1 : vector<2x32xf32> to vector<2x32xbf16>
    %3 = arith.truncf %0 : vector<2x32xf32> to vector<2x32xbf16>
    %c0_3 = arith.constant 0 : index
    %c0_4 = arith.constant 0 : index
    %4 = vector.load %arg2[%c0_3, %c0_4] : memref<32x256xbf16, #tpu.memory_space<vmem>>, vector<32x256xbf16>
    %cst = arith.constant dense<0.000000e+00> : vector<2x256xf32>
    %5 = tpu.matmul %3, %4, %cst {dimension_numbers = #tpu.dot_dimension_numbers<[1], [0], [0], [1], [0, 0, 1, 1], [], []>} : vector<2x32xbf16>, vector<32x256xbf16>, vector<2x256xf32> -> vector<2x256xf32>
    %c0_5 = arith.constant 0 : index
    %c0_6 = arith.constant 0 : index
    %6 = vector.load %arg3[%c0_5, %c0_6] : memref<32x96xbf16, #tpu.memory_space<vmem>>, vector<32x96xbf16>
    %cst_7 = arith.constant dense<0.000000e+00> : vector<2x96xf32>
    %7 = tpu.matmul %2, %6, %cst_7 {dimension_numbers = #tpu.dot_dimension_numbers<[1], [0], [0], [1], [0, 0, 1, 1], [], []>} : vector<2x32xbf16>, vector<32x96xbf16>, vector<2x96xf32> -> vector<2x96xf32>
    %8 = vector.extract_strided_slice %7 {offsets = [0, 0], sizes = [2, 64], strides = [1, 1]} : vector<2x96xf32> to vector<2x64xf32>
    %9 = vector.extract_strided_slice %7 {offsets = [0, 64], sizes = [2, 32], strides = [1, 1]} : vector<2x96xf32> to vector<2x32xf32>
    %10 = tpu.concatenate %8, %8, %8, %8 in 1 : vector<2x64xf32>, vector<2x64xf32>, vector<2x64xf32>, vector<2x64xf32> -> vector<2x256xf32>
    %11 = arith.mulf %5, %10 : vector<2x256xf32>
    %12 = arith.truncf %11 : vector<2x256xf32> to vector<2x256xbf16>
    %c0_8 = arith.constant 0 : index
    %c0_9 = arith.constant 0 : index
    %13 = vector.load %arg4[%c0_8, %c0_9] : memref<256x4xbf16, #tpu.memory_space<vmem>>, vector<256x4xbf16>
    %cst_10 = arith.constant dense<0.000000e+00> : vector<2x4xf32>
    %14 = tpu.matmul %12, %13, %cst_10 {dimension_numbers = #tpu.dot_dimension_numbers<[1], [0], [0], [1], [0, 0, 1, 1], [], []>} : vector<2x256xbf16>, vector<256x4xbf16>, vector<2x4xf32> -> vector<2x4xf32>
    %15 = arith.negf %14 : vector<2x4xf32>
    %16 = math.exp %15 : vector<2x4xf32>
    %cst_11 = arith.constant 1.000000e+00 : f32
    %17 = vector.broadcast %cst_11 : f32 to vector<2x4xf32>
    %18 = arith.addf %17, %16 : vector<2x4xf32>
    %19 = arith.divf %17, %18 : vector<2x4xf32>
    %20 = arith.truncf %19 : vector<2x4xf32> to vector<2x4xbf16>
    %c0_12 = arith.constant 0 : index
    %c0_13 = arith.constant 0 : index
    %21 = vector.load %arg5[%c0_12, %c0_13] : memref<4x128xbf16, #tpu.memory_space<vmem>>, vector<4x128xbf16>
    %cst_14 = arith.constant dense<0.000000e+00> : vector<2x128xf32>
    %22 = tpu.matmul %20, %21, %cst_14 {dimension_numbers = #tpu.dot_dimension_numbers<[1], [0], [0], [1], [0, 0, 1, 1], [], []>} : vector<2x4xbf16>, vector<4x128xbf16>, vector<2x128xf32> -> vector<2x128xf32>
    %23 = tpu.concatenate %9, %9, %9, %9 in 1 : vector<2x32xf32>, vector<2x32xf32>, vector<2x32xf32>, vector<2x32xf32> -> vector<2x128xf32>
    %24 = arith.mulf %22, %23 : vector<2x128xf32>
    %25 = tpu.iota {dimensions = array<i32: 1>} : vector<2x4xi32>
    %cst_15 = arith.constant 0.000000e+00 : f32
    %26 = vector.broadcast %cst_15 : f32 to vector<2x4xf32>
    %27 = vector.extract_strided_slice %19 {offsets = [0, 0], sizes = [2, 1], strides = [1, 1]} : vector<2x4xf32> to vector<2x1xf32>
    %28 = vector.broadcast %27 : vector<2x1xf32> to vector<2x4xf32>
    %29 = arith.cmpf olt, %28, %19 : vector<2x4xf32>
    %30 = vector.broadcast %27 : vector<2x1xf32> to vector<2x4xf32>
    %31 = arith.cmpf oeq, %30, %19 : vector<2x4xf32>
    %c0_i32 = arith.constant 0 : i32
    %32 = vector.broadcast %c0_i32 : i32 to vector<2x4xi32>
    %33 = arith.cmpi sgt, %25, %32 : vector<2x4xi32>
    %34 = arith.andi %31, %33 : vector<2x4xi1>
    %35 = arith.ori %29, %34 : vector<2x4xi1>
    %36 = arith.extui %35 : vector<2x4xi1> to vector<2x4xi32>
    %37 = arith.sitofp %36 : vector<2x4xi32> to vector<2x4xf32>
    %38 = arith.addf %26, %37 : vector<2x4xf32>
    %39 = vector.extract_strided_slice %19 {offsets = [0, 1], sizes = [2, 1], strides = [1, 1]} : vector<2x4xf32> to vector<2x1xf32>
    %40 = vector.broadcast %39 : vector<2x1xf32> to vector<2x4xf32>
    %41 = arith.cmpf olt, %40, %19 : vector<2x4xf32>
    %42 = vector.broadcast %39 : vector<2x1xf32> to vector<2x4xf32>
    %43 = arith.cmpf oeq, %42, %19 : vector<2x4xf32>
    %c1_i32 = arith.constant 1 : i32
    %44 = vector.broadcast %c1_i32 : i32 to vector<2x4xi32>
    %45 = arith.cmpi sgt, %25, %44 : vector<2x4xi32>
    %46 = arith.andi %43, %45 : vector<2x4xi1>
    %47 = arith.ori %41, %46 : vector<2x4xi1>
    %48 = arith.extui %47 : vector<2x4xi1> to vector<2x4xi32>
    %49 = arith.sitofp %48 : vector<2x4xi32> to vector<2x4xf32>
    %50 = arith.addf %38, %49 : vector<2x4xf32>
    %51 = vector.extract_strided_slice %19 {offsets = [0, 2], sizes = [2, 1], strides = [1, 1]} : vector<2x4xf32> to vector<2x1xf32>
    %52 = vector.broadcast %51 : vector<2x1xf32> to vector<2x4xf32>
    %53 = arith.cmpf olt, %52, %19 : vector<2x4xf32>
    %54 = vector.broadcast %51 : vector<2x1xf32> to vector<2x4xf32>
    %55 = arith.cmpf oeq, %54, %19 : vector<2x4xf32>
    %c2_i32 = arith.constant 2 : i32
    %56 = vector.broadcast %c2_i32 : i32 to vector<2x4xi32>
    %57 = arith.cmpi sgt, %25, %56 : vector<2x4xi32>
    %58 = arith.andi %55, %57 : vector<2x4xi1>
    %59 = arith.ori %53, %58 : vector<2x4xi1>
    %60 = arith.extui %59 : vector<2x4xi1> to vector<2x4xi32>
    %61 = arith.sitofp %60 : vector<2x4xi32> to vector<2x4xf32>
    %62 = arith.addf %50, %61 : vector<2x4xf32>
    %63 = vector.extract_strided_slice %19 {offsets = [0, 3], sizes = [2, 1], strides = [1, 1]} : vector<2x4xf32> to vector<2x1xf32>
    %64 = vector.broadcast %63 : vector<2x1xf32> to vector<2x4xf32>
    %65 = arith.cmpf olt, %64, %19 : vector<2x4xf32>
    %66 = vector.broadcast %63 : vector<2x1xf32> to vector<2x4xf32>
    %67 = arith.cmpf oeq, %66, %19 : vector<2x4xf32>
    %c3_i32 = arith.constant 3 : i32
    %68 = vector.broadcast %c3_i32 : i32 to vector<2x4xi32>
    %69 = arith.cmpi sgt, %25, %68 : vector<2x4xi32>
    %70 = arith.andi %67, %69 : vector<2x4xi1>
    %71 = arith.ori %65, %70 : vector<2x4xi1>
    %72 = arith.extui %71 : vector<2x4xi1> to vector<2x4xi32>
    %73 = arith.sitofp %72 : vector<2x4xi32> to vector<2x4xf32>
    %74 = arith.addf %62, %73 : vector<2x4xf32>
    %cst_16 = arith.constant 1.000000e+00 : f32
    %75 = vector.broadcast %cst_16 : f32 to vector<2x4xf32>
    %76 = arith.cmpf oge, %74, %75 : vector<2x4xf32>
    %77 = arith.extui %76 : vector<2x4xi1> to vector<2x4xi32>
    %78 = arith.sitofp %77 : vector<2x4xi32> to vector<2x4xf32>
    %79 = arith.truncf %78 : vector<2x4xf32> to vector<2x4xbf16>
    %c0_17 = arith.constant 0 : index
    %c0_18 = arith.constant 0 : index
    %80 = vector.load %arg6[%c0_17, %c0_18] : memref<4x32xbf16, #tpu.memory_space<vmem>>, vector<4x32xbf16>
    %cst_19 = arith.constant dense<0.000000e+00> : vector<2x32xf32>
    %81 = tpu.matmul %79, %80, %cst_19 {dimension_numbers = #tpu.dot_dimension_numbers<[1], [0], [0], [1], [0, 0, 1, 1], [], []>} : vector<2x4xbf16>, vector<4x32xbf16>, vector<2x32xf32> -> vector<2x32xf32>
    %82 = tpu.concatenate %24, %0 in 1 : vector<2x128xf32>, vector<2x32xf32> -> vector<2x160xf32>
    %83 = arith.truncf %82 : vector<2x160xf32> to vector<2x160xbf16>
    %c0_20 = arith.constant 0 : index
    %c0_21 = arith.constant 0 : index
    %84 = vector.load %arg7[%c0_20, %c0_21] : memref<160x192xbf16, #tpu.memory_space<vmem>>, vector<160x192xbf16>
    %cst_22 = arith.constant dense<0.000000e+00> : vector<2x192xf32>
    %85 = tpu.matmul %83, %84, %cst_22 {dimension_numbers = #tpu.dot_dimension_numbers<[1], [0], [0], [1], [0, 0, 1, 1], [], []>} : vector<2x160xbf16>, vector<160x192xbf16>, vector<2x192xf32> -> vector<2x192xf32>
    %c0_23 = arith.constant 0 : index
    %c0_24 = arith.constant 0 : index
    %86 = vector.load %arg8[%c0_23, %c0_24] : memref<1x192xf32, #tpu.memory_space<vmem>>, vector<1x192xf32>
    %87 = vector.broadcast %86 : vector<1x192xf32> to vector<2x192xf32>
    %88 = arith.addf %85, %87 : vector<2x192xf32>
    %89 = vector.extract_strided_slice %88 {offsets = [0, 0], sizes = [2, 64], strides = [1, 1]} : vector<2x192xf32> to vector<2x64xf32>
    %90 = vector.extract_strided_slice %88 {offsets = [0, 64], sizes = [2, 32], strides = [1, 1]} : vector<2x192xf32> to vector<2x32xf32>
    %91 = vector.extract_strided_slice %88 {offsets = [0, 96], sizes = [2, 64], strides = [1, 1]} : vector<2x192xf32> to vector<2x64xf32>
    %92 = vector.extract_strided_slice %88 {offsets = [0, 160], sizes = [2, 32], strides = [1, 1]} : vector<2x192xf32> to vector<2x32xf32>
    %93 = arith.addf %89, %91 : vector<2x64xf32>
    %94 = arith.negf %93 : vector<2x64xf32>
    %95 = math.exp %94 : vector<2x64xf32>
    %cst_25 = arith.constant 1.000000e+00 : f32
    %96 = vector.broadcast %cst_25 : f32 to vector<2x64xf32>
    %97 = arith.addf %96, %95 : vector<2x64xf32>
    %98 = arith.divf %96, %97 : vector<2x64xf32>
    %99 = vector.extract_strided_slice %98 {offsets = [0, 0], sizes = [2, 32], strides = [1, 1]} : vector<2x64xf32> to vector<2x32xf32>
    %100 = vector.extract_strided_slice %98 {offsets = [0, 32], sizes = [2, 32], strides = [1, 1]} : vector<2x64xf32> to vector<2x32xf32>
    %101 = arith.mulf %99, %92 : vector<2x32xf32>
    %102 = arith.addf %90, %101 : vector<2x32xf32>
    %103 = math.tanh %102 : vector<2x32xf32>
    %cst_26 = arith.constant 1.000000e+00 : f32
    %104 = vector.broadcast %cst_26 : f32 to vector<2x32xf32>
    %105 = arith.subf %104, %100 : vector<2x32xf32>
    %106 = arith.mulf %105, %103 : vector<2x32xf32>
    %107 = arith.mulf %100, %0 : vector<2x32xf32>
    %108 = arith.addf %106, %107 : vector<2x32xf32>
    %109 = arith.truncf %108 : vector<2x32xf32> to vector<2x32xbf16>
    %c0_27 = arith.constant 0 : index
    %c0_28 = arith.constant 0 : index
    %110 = vector.load %arg9[%c0_27, %c0_28] : memref<32x768xbf16, #tpu.memory_space<vmem>>, vector<32x768xbf16>
    %cst_29 = arith.constant dense<0.000000e+00> : vector<2x768xf32>
    %111 = tpu.matmul %109, %110, %cst_29 {dimension_numbers = #tpu.dot_dimension_numbers<[1], [0], [0], [1], [0, 0, 1, 1], [], []>} : vector<2x32xbf16>, vector<32x768xbf16>, vector<2x768xf32> -> vector<2x768xf32>
    %112 = vector.extract_strided_slice %111 {offsets = [0, 0], sizes = [2, 256], strides = [1, 1]} : vector<2x768xf32> to vector<2x256xf32>
    %113 = vector.extract_strided_slice %111 {offsets = [0, 256], sizes = [2, 256], strides = [1, 1]} : vector<2x768xf32> to vector<2x256xf32>
    %114 = vector.extract_strided_slice %111 {offsets = [0, 512], sizes = [2, 256], strides = [1, 1]} : vector<2x768xf32> to vector<2x256xf32>
    %115 = vector.extract_strided_slice %113 {offsets = [0, 0], sizes = [2, 64], strides = [1, 1]} : vector<2x256xf32> to vector<2x64xf32>
    %116 = tpu.concatenate %115, %115, %115, %115 in 1 : vector<2x64xf32>, vector<2x64xf32>, vector<2x64xf32>, vector<2x64xf32> -> vector<2x256xf32>
    %117 = arith.mulf %112, %116 : vector<2x256xf32>
    %118 = arith.truncf %117 : vector<2x256xf32> to vector<2x256xbf16>
    %c0_30 = arith.constant 0 : index
    %c0_31 = arith.constant 0 : index
    %119 = vector.load %arg10[%c0_30, %c0_31] : memref<256x16xbf16, #tpu.memory_space<vmem>>, vector<256x16xbf16>
    %cst_32 = arith.constant dense<0.000000e+00> : vector<2x16xf32>
    %120 = tpu.matmul %118, %119, %cst_32 {dimension_numbers = #tpu.dot_dimension_numbers<[1], [0], [0], [1], [0, 0, 1, 1], [], []>} : vector<2x256xbf16>, vector<256x16xbf16>, vector<2x16xf32> -> vector<2x16xf32>
    %121 = vector.extract_strided_slice %113 {offsets = [0, 64], sizes = [2, 64], strides = [1, 1]} : vector<2x256xf32> to vector<2x64xf32>
    %122 = tpu.concatenate %121, %121, %121, %121 in 1 : vector<2x64xf32>, vector<2x64xf32>, vector<2x64xf32>, vector<2x64xf32> -> vector<2x256xf32>
    %123 = arith.mulf %112, %122 : vector<2x256xf32>
    %124 = arith.truncf %123 : vector<2x256xf32> to vector<2x256xbf16>
    %c0_33 = arith.constant 0 : index
    %c0_34 = arith.constant 0 : index
    %125 = vector.load %arg10[%c0_33, %c0_34] : memref<256x16xbf16, #tpu.memory_space<vmem>>, vector<256x16xbf16>
    %cst_35 = arith.constant dense<0.000000e+00> : vector<2x16xf32>
    %126 = tpu.matmul %124, %125, %cst_35 {dimension_numbers = #tpu.dot_dimension_numbers<[1], [0], [0], [1], [0, 0, 1, 1], [], []>} : vector<2x256xbf16>, vector<256x16xbf16>, vector<2x16xf32> -> vector<2x16xf32>
    %127 = vector.extract_strided_slice %113 {offsets = [0, 128], sizes = [2, 64], strides = [1, 1]} : vector<2x256xf32> to vector<2x64xf32>
    %128 = tpu.concatenate %127, %127, %127, %127 in 1 : vector<2x64xf32>, vector<2x64xf32>, vector<2x64xf32>, vector<2x64xf32> -> vector<2x256xf32>
    %129 = arith.mulf %112, %128 : vector<2x256xf32>
    %130 = arith.truncf %129 : vector<2x256xf32> to vector<2x256xbf16>
    %c0_36 = arith.constant 0 : index
    %c0_37 = arith.constant 0 : index
    %131 = vector.load %arg10[%c0_36, %c0_37] : memref<256x16xbf16, #tpu.memory_space<vmem>>, vector<256x16xbf16>
    %cst_38 = arith.constant dense<0.000000e+00> : vector<2x16xf32>
    %132 = tpu.matmul %130, %131, %cst_38 {dimension_numbers = #tpu.dot_dimension_numbers<[1], [0], [0], [1], [0, 0, 1, 1], [], []>} : vector<2x256xbf16>, vector<256x16xbf16>, vector<2x16xf32> -> vector<2x16xf32>
    %133 = vector.extract_strided_slice %113 {offsets = [0, 192], sizes = [2, 64], strides = [1, 1]} : vector<2x256xf32> to vector<2x64xf32>
    %134 = tpu.concatenate %133, %133, %133, %133 in 1 : vector<2x64xf32>, vector<2x64xf32>, vector<2x64xf32>, vector<2x64xf32> -> vector<2x256xf32>
    %135 = arith.mulf %112, %134 : vector<2x256xf32>
    %136 = arith.truncf %135 : vector<2x256xf32> to vector<2x256xbf16>
    %c0_39 = arith.constant 0 : index
    %c0_40 = arith.constant 0 : index
    %137 = vector.load %arg10[%c0_39, %c0_40] : memref<256x16xbf16, #tpu.memory_space<vmem>>, vector<256x16xbf16>
    %cst_41 = arith.constant dense<0.000000e+00> : vector<2x16xf32>
    %138 = tpu.matmul %136, %137, %cst_41 {dimension_numbers = #tpu.dot_dimension_numbers<[1], [0], [0], [1], [0, 0, 1, 1], [], []>} : vector<2x256xbf16>, vector<256x16xbf16>, vector<2x16xf32> -> vector<2x16xf32>
    %139 = arith.maximumf %120, %126 : vector<2x16xf32>
    %140 = arith.maximumf %139, %132 : vector<2x16xf32>
    %141 = arith.maximumf %140, %138 : vector<2x16xf32>
    %142 = arith.subf %120, %141 : vector<2x16xf32>
    %143 = math.exp %142 : vector<2x16xf32>
    %144 = arith.subf %126, %141 : vector<2x16xf32>
    %145 = math.exp %144 : vector<2x16xf32>
    %146 = arith.subf %132, %141 : vector<2x16xf32>
    %147 = math.exp %146 : vector<2x16xf32>
    %148 = arith.subf %138, %141 : vector<2x16xf32>
    %149 = math.exp %148 : vector<2x16xf32>
    %150 = arith.addf %143, %145 : vector<2x16xf32>
    %151 = arith.addf %150, %147 : vector<2x16xf32>
    %152 = arith.addf %151, %149 : vector<2x16xf32>
    %153 = tpu.reciprocal %152 {approx = true} : vector<2x16xf32> -> vector<2x16xf32>
    %cst_42 = arith.constant 0.000000e+00 : f32
    %154 = vector.broadcast %cst_42 : f32 to vector<2x256xf32>
    %155 = arith.mulf %143, %153 : vector<2x16xf32>
    %156 = arith.truncf %155 : vector<2x16xf32> to vector<2x16xbf16>
    %c0_43 = arith.constant 0 : index
    %c0_44 = arith.constant 0 : index
    %157 = vector.load %arg11[%c0_43, %c0_44] : memref<16x256xbf16, #tpu.memory_space<vmem>>, vector<16x256xbf16>
    %cst_45 = arith.constant dense<0.000000e+00> : vector<2x256xf32>
    %158 = tpu.matmul %156, %157, %cst_45 {dimension_numbers = #tpu.dot_dimension_numbers<[1], [0], [0], [1], [0, 0, 1, 1], [], []>} : vector<2x16xbf16>, vector<16x256xbf16>, vector<2x256xf32> -> vector<2x256xf32>
    %159 = vector.extract_strided_slice %114 {offsets = [0, 0], sizes = [2, 64], strides = [1, 1]} : vector<2x256xf32> to vector<2x64xf32>
    %160 = tpu.concatenate %159, %159, %159, %159 in 1 : vector<2x64xf32>, vector<2x64xf32>, vector<2x64xf32>, vector<2x64xf32> -> vector<2x256xf32>
    %161 = arith.mulf %158, %160 : vector<2x256xf32>
    %162 = arith.addf %154, %161 : vector<2x256xf32>
    %163 = arith.mulf %145, %153 : vector<2x16xf32>
    %164 = arith.truncf %163 : vector<2x16xf32> to vector<2x16xbf16>
    %c0_46 = arith.constant 0 : index
    %c0_47 = arith.constant 0 : index
    %165 = vector.load %arg11[%c0_46, %c0_47] : memref<16x256xbf16, #tpu.memory_space<vmem>>, vector<16x256xbf16>
    %cst_48 = arith.constant dense<0.000000e+00> : vector<2x256xf32>
    %166 = tpu.matmul %164, %165, %cst_48 {dimension_numbers = #tpu.dot_dimension_numbers<[1], [0], [0], [1], [0, 0, 1, 1], [], []>} : vector<2x16xbf16>, vector<16x256xbf16>, vector<2x256xf32> -> vector<2x256xf32>
    %167 = vector.extract_strided_slice %114 {offsets = [0, 64], sizes = [2, 64], strides = [1, 1]} : vector<2x256xf32> to vector<2x64xf32>
    %168 = tpu.concatenate %167, %167, %167, %167 in 1 : vector<2x64xf32>, vector<2x64xf32>, vector<2x64xf32>, vector<2x64xf32> -> vector<2x256xf32>
    %169 = arith.mulf %166, %168 : vector<2x256xf32>
    %170 = arith.addf %162, %169 : vector<2x256xf32>
    %171 = arith.mulf %147, %153 : vector<2x16xf32>
    %172 = arith.truncf %171 : vector<2x16xf32> to vector<2x16xbf16>
    %c0_49 = arith.constant 0 : index
    %c0_50 = arith.constant 0 : index
    %173 = vector.load %arg11[%c0_49, %c0_50] : memref<16x256xbf16, #tpu.memory_space<vmem>>, vector<16x256xbf16>
    %cst_51 = arith.constant dense<0.000000e+00> : vector<2x256xf32>
    %174 = tpu.matmul %172, %173, %cst_51 {dimension_numbers = #tpu.dot_dimension_numbers<[1], [0], [0], [1], [0, 0, 1, 1], [], []>} : vector<2x16xbf16>, vector<16x256xbf16>, vector<2x256xf32> -> vector<2x256xf32>
    %175 = vector.extract_strided_slice %114 {offsets = [0, 128], sizes = [2, 64], strides = [1, 1]} : vector<2x256xf32> to vector<2x64xf32>
    %176 = tpu.concatenate %175, %175, %175, %175 in 1 : vector<2x64xf32>, vector<2x64xf32>, vector<2x64xf32>, vector<2x64xf32> -> vector<2x256xf32>
    %177 = arith.mulf %174, %176 : vector<2x256xf32>
    %178 = arith.addf %170, %177 : vector<2x256xf32>
    %179 = arith.mulf %149, %153 : vector<2x16xf32>
    %180 = arith.truncf %179 : vector<2x16xf32> to vector<2x16xbf16>
    %c0_52 = arith.constant 0 : index
    %c0_53 = arith.constant 0 : index
    %181 = vector.load %arg11[%c0_52, %c0_53] : memref<16x256xbf16, #tpu.memory_space<vmem>>, vector<16x256xbf16>
    %cst_54 = arith.constant dense<0.000000e+00> : vector<2x256xf32>
    %182 = tpu.matmul %180, %181, %cst_54 {dimension_numbers = #tpu.dot_dimension_numbers<[1], [0], [0], [1], [0, 0, 1, 1], [], []>} : vector<2x16xbf16>, vector<16x256xbf16>, vector<2x256xf32> -> vector<2x256xf32>
    %183 = vector.extract_strided_slice %114 {offsets = [0, 192], sizes = [2, 64], strides = [1, 1]} : vector<2x256xf32> to vector<2x64xf32>
    %184 = tpu.concatenate %183, %183, %183, %183 in 1 : vector<2x64xf32>, vector<2x64xf32>, vector<2x64xf32>, vector<2x64xf32> -> vector<2x256xf32>
    %185 = arith.mulf %182, %184 : vector<2x256xf32>
    %186 = arith.addf %178, %185 : vector<2x256xf32>
    %187 = arith.truncf %186 : vector<2x256xf32> to vector<2x256xbf16>
    %c0_55 = arith.constant 0 : index
    %c0_56 = arith.constant 0 : index
    %188 = vector.load %arg12[%c0_55, %c0_56] : memref<256x64xbf16, #tpu.memory_space<vmem>>, vector<256x64xbf16>
    %cst_57 = arith.constant dense<0.000000e+00> : vector<2x64xf32>
    %189 = tpu.matmul %187, %188, %cst_57 {dimension_numbers = #tpu.dot_dimension_numbers<[1], [0], [0], [1], [0, 0, 1, 1], [], []>} : vector<2x256xbf16>, vector<256x64xbf16>, vector<2x64xf32> -> vector<2x64xf32>
    %c0_58 = arith.constant 0 : index
    %c0_59 = arith.constant 0 : index
    %190 = vector.load %arg13[%c0_58, %c0_59] : memref<1x64xf32, #tpu.memory_space<vmem>>, vector<1x64xf32>
    %191 = vector.broadcast %190 : vector<1x64xf32> to vector<2x64xf32>
    %192 = arith.addf %189, %191 : vector<2x64xf32>
    %193 = vector.extract_strided_slice %192 {offsets = [0, 32], sizes = [2, 32], strides = [1, 1]} : vector<2x64xf32> to vector<2x32xf32>
    %194 = arith.negf %193 : vector<2x32xf32>
    %195 = math.exp %194 : vector<2x32xf32>
    %cst_60 = arith.constant 1.000000e+00 : f32
    %196 = vector.broadcast %cst_60 : f32 to vector<2x32xf32>
    %197 = arith.addf %196, %195 : vector<2x32xf32>
    %198 = arith.divf %196, %197 : vector<2x32xf32>
    %199 = vector.extract_strided_slice %192 {offsets = [0, 0], sizes = [2, 32], strides = [1, 1]} : vector<2x64xf32> to vector<2x32xf32>
    %200 = math.tanh %199 : vector<2x32xf32>
    %201 = arith.mulf %198, %200 : vector<2x32xf32>
    %202 = arith.addf %108, %201 : vector<2x32xf32>
    %203 = arith.mulf %81, %202 : vector<2x32xf32>
    %cst_61 = arith.constant 1.000000e+00 : f32
    %204 = vector.broadcast %cst_61 : f32 to vector<2x32xf32>
    %205 = arith.subf %204, %81 : vector<2x32xf32>
    %206 = arith.mulf %205, %0 : vector<2x32xf32>
    %207 = arith.addf %203, %206 : vector<2x32xf32>
    %c0_62 = arith.constant 0 : index
    %c0_63 = arith.constant 0 : index
    %208 = vector.load %arg14[%c0_62, %c0_63] : memref<2x32xf32, #tpu.memory_space<vmem>>, vector<2x32xf32>
    tpu.vector_store %arg14[%c0_62, %c0_63], %207 {strides = array<i32>} : memref<2x32xf32, #tpu.memory_space<vmem>>, vector<2x32xf32>,
    %c0_64 = arith.constant 0 : index
    %c0_65 = arith.constant 0 : index
    %209 = vector.load %arg15[%c0_64, %c0_65] : memref<2x32xf32, #tpu.memory_space<vmem>>, vector<2x32xf32>
    tpu.vector_store %arg15[%c0_64, %c0_65], %81 {strides = array<i32>} : memref<2x32xf32, #tpu.memory_space<vmem>>, vector<2x32xf32>,
    return
  }
}

</mosaic_0001>

<bundles_post_ra>
// kernel: tpu_custom_call.1
= control target key start
LH: loop header
LB: loop body
LE: loop exit
PB: predicated region body
PF: predicated region fallthrough
CT: control target
= control target key end

     0   :  { %21 = vsyncpa [#allocation3], 0  ;;  %v2195_v2 = vmov 0   ;;  %vm2800_vm0 = vcmask 261120   ;;  %v2196_v8 = vmov 0.0   ;;  %vm2197_vm1 = vmmov 0   ;;  %s2783_s0 = inlined_call_operand.vmem [shape: f32[2,32], index: 0, kind: input, shape index: {}]   ;;  %s2784_s1 = inlined_call_operand.vmem [shape: f32[2,32], index: 1, kind: input, shape index: {}]   ;;  %s2785_s2 = inlined_call_operand.vmem [shape: bf16[32,256], index: 2, kind: input, shape index: {}]   ;;  %s2786_s3 = inlined_call_operand.vmem [shape: bf16[32,96], index: 3, kind: input, shape index: {}]   ;;  %s2787_s4 = inlined_call_operand.vmem [shape: bf16[256,4], index: 4, kind: input, shape index: {}]   ;;  %s2788_s5 = inlined_call_operand.vmem [shape: bf16[4,128], index: 5, kind: input, shape index: {}]   ;;  %s2789_s6 = inlined_call_operand.vmem [shape: bf16[4,32], index: 6, kind: input, shape index: {}]   ;;  %s2790_s7 = inlined_call_operand.vmem [shape: bf16[160,192], index: 7, kind: input, shape index: {}]   ;;  %s2791_s8 = inlined_call_operand.vmem [shape: f32[1,192], index: 8, kind: input, shape index: {}]   ;;  %s2792_s9 = inlined_call_operand.vmem [shape: bf16[32,768], index: 9, kind: input, shape index: {}]   ;;  %s2793_s10 = inlined_call_operand.vmem [shape: bf16[256,16], index: 10, kind: input, shape index: {}]   ;;  %s2794_s11 = inlined_call_operand.vmem [shape: bf16[16,256], index: 11, kind: input, shape index: {}]   ;;  %s2795_s12 = inlined_call_operand.vmem [shape: bf16[256,64], index: 12, kind: input, shape index: {}]   ;;  %s2796_s13 = inlined_call_operand.vmem [shape: f32[1,64], index: 13, kind: input, shape index: {}]   ;;  %s2797_s14 = inlined_call_operand.hbm [shape: f32[2,32], index: 14, kind: output, shape index: {0}]   ;;  %s2798_s15 = inlined_call_operand.hbm [shape: f32[2,32], index: 15, kind: output, shape index: {1}]  }
   0x1   :  { %v2017_v0 = vld [vmem:[%s2785_s2 + $0x14] ss:$8 sps:$4 sm:$0xff]   ;;  %v2019_v1 = vld [vmem:[%s2785_s2 + $0x10] ss:$8 sps:$4 sm:$0xff]   ;;  %116 = vmatprep.mubr.bf16.mxu1 %v2195_v2  ;;  %2012 = vset.pattern.permute.xlu0 %v2195_v2  ;;  %v2020_v3 = vld [vmem:[%s2785_s2 + $0x4] ss:$8 sps:$4 sm:$0xff]  }
   0x2   :  { %96 = vmatprep.subr.bf16.mxu1 %v2017_v0  ;;  %v2022_v4 = vld [vmem:[%s2785_s2] ss:$8 sps:$4 sm:$0xff]  }
   0x3   :  { %97 = vmatpush1.bf16.msra.mxu1 %v2019_v1  ;;  %v2303_v5 = vld [vmem:[%s2784_s1] sm:$0x3]  ;;  %v2023_v6 = vld [vmem:[%s2786_s3 + $0x8] sm:$0xff]  }
   0x4   :  { %98 = vmatprep.subr.bf16.mxu1 %v2020_v3  ;;  %v2310_v7 = vpack.c.bf16 %v2303_v5, %v2303_v5  ;;  %v2024_v9 = vld [vmem:[%s2786_s3] sm:$0xff]  }
   0x5   :  { %v53_v10 = vld [vmem:[%s2783_s0] sm:$0x3] }
   0x6   :  { %v54_v11 = vpack.c.bf16 %v53_v10, %v53_v10 }
   0x7   :  { %99 = vmatpush1.bf16.msra.mxu1 %v2022_v4 }
   0x8   :  { %1981 = vmatprep.subr.bf16.mxu1 %v2196_v8 }
   0xa   :  { %1737 = vmatmul.mubr.msk.bf16.vlgmr.msra.gmra.mxu1 %vm2800_vm0, %v2310_v7 }
   0xb   :  { %1982 = vmatpush3.bf16.msra.mxu1 %v2023_v6  ;;  %1985 = vmatprep.mubr.msk.bf16.mxu1 %vm2197_vm1, %v2196_v8 }
   0xc   :  { %1983 = vmatprep.subr.bf16.mxu1 %v2196_v8 }
   0xf   :  { %1984 = vmatpush3.bf16.msra.mxu1 %v2024_v9 }
  0x10   :  { %1989 = vmatprep.subr.bf16.mxu1 %v2196_v8 }
  0x12   :  { %1986 = vmatmul.mubr.msk.bf16.vlgmr.msra.gmra.mxu1 %vm2800_vm0, %v54_v11 }
  0x13   :  { %1991 = vmatprep.mubr.msk.bf16.mxu1 %vm2197_vm1, %v2196_v8 }
  0x14   :  { %22 = vsyncpa [#allocation5], 0  ;;  %v2025_v12 = vld [vmem:[%s2787_s4 + $0x78] sm:$0xff]   ;;  %v2027_v14 = vld [vmem:[%s2787_s4 + $0x70] sm:$0xff]   ;;  %s2198_s2 = smov 64   ;;  %vm2799_vm2 = vcmask 523264   ;;  %v429_v60 = vlaneseq }
  0x15   :  { %v2026_v13 = vld [vmem:[%s2787_s4 + $0x38] sm:$0xff]   ;;  %1845 = vmatprep.subr.bf16.mxu0 %v2025_v12  ;;  %v2028_v15 = vld [vmem:[%s2787_s4 + $0x30] sm:$0xff]   ;;  %v2029_v16 = vld [vmem:[%s2787_s4 + $0x68] sm:$0xff]   ;;  %vm374_vm3 = vcmask 1041408   ;;  %v2199_v44 = vmov 1   ;;  %vm2801_vm4 = vcmask 31744  }
  0x16   :  { %1846 = vmatpush3.bf16.msra.mxu0 %v2026_v13  ;;  %v2030_v17 = vld [vmem:[%s2787_s4 + $0x28] sm:$0xff]   ;;  %v2031_v18 = vld [vmem:[%s2787_s4 + $0x60] sm:$0xff]   ;;  %v2033_v20 = vld [vmem:[%s2787_s4 + $0x58] sm:$0xff]   ;;  %2013 = vset.pattern.permute.xlu1 %v2199_v44  ;;  %v2200_v55 = vmov 2   ;;  %v2202_v56 = vmov 3   ;;  %s2203_s0 = smov 32  }
  0x17   :  { %1847 = vmatprep.subr.bf16.mxu0 %v2027_v14  ;;  %v2032_v19 = vld [vmem:[%s2787_s4 + $0x20] sm:$0xff]   ;;  %v2034_v21 = vld [vmem:[%s2787_s4 + $0x18] sm:$0xff]   ;;  %v2035_v22 = vld [vmem:[%s2787_s4 + $0x50] sm:$0xff]   ;;  %v430_v61 = vand.u32 127, %v429_v60  ;;  %s2204_s24 = smov [#allocation4]  }
  0x18   :  { %v2036_v23 = vld [vmem:[%s2787_s4 + $0x10] sm:$0xff]   ;;  %v2037_v24 = vld [vmem:[%s2787_s4 + $0x48] sm:$0xff]   ;;  %v2039_v26 = vld [vmem:[%s2787_s4 + $0x40] sm:$0xff]   ;;  %s1721_s25 = sshll.u32 %s2204_s24, 4  ;;  %s1722_s25 = int_to_ptr.vmem [resolvable:$true] %s1721_s25 }
  0x19   :  { %v2038_v25 = vld [vmem:[%s2787_s4 + $0x8] sm:$0xff]   ;;  %v2040_v27 = vld [vmem:[%s2787_s4] sm:$0xff]   ;;  %v2043_v59 = vld [vmem:[%s2790_s7 + $0x74] ss:$8 sps:$4 sm:$0xff]   ;;  %vm450_vm5 = vcmp.gt.s32.totalorder %v430_v61, 1  ;;  %vm438_vm8 = vcmp.gt.s32.totalorder %v430_v61, 0  ;;  %p2156_p1 = scmp.lt.s32.totalorder %s1722_s25, %s1722_s25 }
  0x1a   :  { %1848 = vmatpush3.bf16.msra.mxu0 %v2028_v15  ;;  %v369_v42 = vld [vmem:[%s2788_s5] sm:$0x3]  ;;  %s2201_s5 = smov 96   ;;  %vm462_vm14 = vcmp.gt.s32.totalorder %v430_v61, 2  ;;  %v2041_v14 = vld [vmem:[%s2790_s7 + $0x70] ss:$8 sps:$4 sm:$0xff]  }
  0x1b   :  { %1849 = vmatprep.subr.bf16.mxu0 %v2029_v16  ;;  %v376_v43 = vsel %vm374_vm3, %v369_v42, 0  ;;  %v484_v57 = vld [vmem:[%s2789_s6] sm:$0x3]  ;;  %v2046_v16 = vld [vmem:[%s2790_s7 + $0x64] ss:$8 sps:$4 sm:$0xff]   ;;  %s2151_s26 = scalar_lea.vmem %s1722_s25, 32 }
  0x1c   :  { %1990 = vmatpush3.bf16.msra.mxu1 %v376_v43  ;;  %v489_v58 = vsel %vm374_vm3, %v484_v57, 0  ;;  %p2152_p0 = scmp.ne.s32.totalorder %s1722_s25, %s2151_s26  ;;  %p2157_p2 = scmp.lt.s32.totalorder %s2151_s26, %s2151_s26 }
  0x1d   :  { %1995 = vmatprep.subr.bf16.mxu1 %v2196_v8 }
  0x1e   :  { %1850 = vmatpush3.bf16.msra.mxu0 %v2030_v17  ;;  %v2044_v17 = vld [vmem:[%s2790_s7 + $0x60] ss:$8 sps:$4 sm:$0xff]   ;;  %p2158_p3 = por %p2157_p2, %p2156_p1 }
  0x1f   :  { %1851 = vmatprep.subr.bf16.mxu0 %v2031_v18  ;;  %v2047_v18 = vld [vmem:[%s2790_s7 + $0x50] ss:$8 sps:$4 sm:$0xff]  }
  0x20   :  { %p2159_p4 = pnand %p2158_p3, %p2152_p0 }
  0x22   :  { %1852 = vmatpush3.bf16.msra.mxu0 %v2032_v19  ;;  %v2052_v19 = vld [vmem:[%s2790_s7 + $0x44] ss:$8 sps:$4 sm:$0xff]  }
  0x23   :  { %1853 = vmatprep.subr.bf16.mxu0 %v2033_v20  ;;  %v2055_v20 = vld [vmem:[%s2790_s7 + $0x34] ss:$8 sps:$4 sm:$0xff]  }
  0x26   :  { %1854 = vmatpush3.bf16.msra.mxu0 %v2034_v21  ;;  %v2053_v21 = vld [vmem:[%s2790_s7 + $0x30] ss:$8 sps:$4 sm:$0xff]  }
  0x27   :  { %1855 = vmatprep.subr.bf16.mxu0 %v2035_v22  ;;  %v2058_v22 = vld [vmem:[%s2790_s7 + $0x24] ss:$8 sps:$4 sm:$0xff]  }
  0x2a   :  { %1856 = vmatpush3.bf16.msra.mxu0 %v2036_v23  ;;  %v2056_v23 = vld [vmem:[%s2790_s7 + $0x20] ss:$8 sps:$4 sm:$0xff]  }
  0x2b   :  { %1857 = vmatprep.subr.bf16.mxu0 %v2037_v24  ;;  %v2061_v24 = vld [vmem:[%s2790_s7 + $0x14] ss:$8 sps:$4 sm:$0xff]  }
  0x2e   :  { %1858 = vmatpush3.bf16.msra.mxu0 %v2038_v25  ;;  %v2059_v25 = vld [vmem:[%s2790_s7 + $0x10] ss:$8 sps:$4 sm:$0xff]  }
  0x2f   :  { %1859 = vmatprep.subr.bf16.mxu0 %v2039_v26  ;;  %v2064_v26 = vld [vmem:[%s2790_s7 + $0x4] ss:$8 sps:$4 sm:$0xff]  }
  0x32   :  { %1860 = vmatpush3.bf16.msra.mxu0 %v2040_v27  ;;  %v2062_v27 = vld [vmem:[%s2790_s7] ss:$8 sps:$4 sm:$0xff]  }
  0xca   :  { %v118_v28 = vpop.f32.mrf.mxu1 }
  0xcc   :  { %v120_v29 = vpop.f32.mrf.mxu1 }
  0xce   :  { %v122_v30 = vpop.f32.mrf.mxu1 }
  0xcf   :  { %v2070_v30 = vld [vmem:[%s2790_s7 + $0x84] ss:$8 sps:$4 sm:$0xff]  }
  0xd0   :  { %v123_v31 = vpop.f32.mrf.mxu1 }
  0xd1   :  { %v2068_v31 = vld [vmem:[%s2790_s7 + $0x80] ss:$8 sps:$4 sm:$0xff]  }
  0xd2   :  { %v2376_v32 = vpop.f32.mrf.mxu1 }
  0xd3   :  { %185 = vrot.lane.b32.xlu0 %v2376_v32, %s2198_s2 }
  0xd4   :  { %v1987_v33 = vpop.f32.mrf.mxu1 }
  0xd6   :  { %v181_v34 = vpop.f32.mrf.mxu1 }
  0xd8   :  { %v1988_v35 = vpop.f32.mrf.mxu1 }
 0x145   :  { %v2380_v36 = vpop.permute.xlu0 %185 }
 0x146   :  { %v189_v37 = vsel %vm2799_vm2, %v2376_v32, %v2380_v36 }
 0x147   :  { %v190_v38 = vmul.f32 %v189_v37, %v118_v28  ;;  %v191_v39 = vmul.f32 %v189_v37, %v120_v29  ;;  %v2067_v28 = vld [vmem:[%s2790_s7 + $0x94] ss:$8 sps:$4 sm:$0xff]   ;;  %v2065_v29 = vld [vmem:[%s2790_s7 + $0x90] ss:$8 sps:$4 sm:$0xff]  }
 0x149   :  { %v192_v40 = vpack.c.bf16 %v190_v38, %v190_v38  ;;  %v193_v41 = vpack.c.bf16 %v191_v39, %v191_v39 }
 0x14b   :  { %354 = vmatprep.mubr.bf16.mxu0 %v193_v41 }
 0x14c   :  { %355 = vmatmul.mubr.bf16.vlgmr.msra.gmra.mxu0 %v192_v40 }
 0x14d   :  { %894 = vmatprep.mubr.bf16.mxu0 %v2195_v2 }
 0x20c   :  { %v1861_v45 = vpop.f32.mrf.mxu0 }
 0x20e   :  { %v1862_v46 = vpop.f32.mrf.mxu0 }
 0x20f   :  { %v1863_v47 = vadd.f32 %v1862_v46, %v1861_v45 }
 0x210   :  { %v1864_v48 = vpop.f32.mrf.mxu0 }
 0x211   :  { %v1757_v49 = vmul.f32 -1.442695, %v1863_v47 }
 0x212   :  { %v1865_v50 = vpop.f32.mrf.mxu0 }
 0x213   :  { %2124 = vpow2.f32 %v1757_v49  ;;  %v552_v49 = vld [vmem:[%s2791_s8] sm:$0x3] }
 0x220   :  { %v2125_v51 = vpop.eup %2124 }
 0x221   :  { %v365_v52 = vadd.f32 1.0, %v2125_v51 }
 0x223   :  { %2126 = vrcp.f32 %v365_v52 }
 0x230   :  { %v2127_v53 = vpop.eup %2126 }
 0x231   :  { %445 = vperm.xlu1 %2013, %v2127_v53   ;;  %433 = vperm.xlu0 %2012, %v2127_v53   ;;  %v368_v54 = vpack.c.bf16 %v2127_v53, %v2127_v53 }
 0x233   :  { %1992 = vmatmul.mubr.msk.bf16.vlgmr.msra.gmra.mxu1 %vm2801_vm4, %v368_v54  ;;  %vm474_vm4 = vcmp.gt.s32.totalorder %v430_v61, 3 }
 0x234   :  { %1997 = vmatprep.mubr.msk.bf16.mxu1 %vm2197_vm1, %v2196_v8  ;;  %1996 = vmatpush3.bf16.msra.mxu1 %v489_v58 }
 0x235   :  { %2014 = vset.pattern.permute.xlu1 %v2200_v55  ;;  %418 = vrot.lane.b32.xlu0 %v2376_v32, %s2201_s5 }
 0x236   :  { %457 = vperm.xlu1 %2014, %v2127_v53   ;;  %2016 = vset.pattern.permute.xlu0 %v2202_v56 }
 0x237   :  { %664 = vmatprep.subr.bf16.mxu1 %v2043_v59 }
 0x23a   :  { %2015 = vset.pattern.permute.xlu1 %v2202_v56 }
 0x23b   :  { %469 = vperm.xlu1 %2015, %v2127_v53  }
 0x23f   :  { %421 = vrot.lane.b32.xlu1 %v2376_v32, %s2203_s0 }
 0x2ac   :  { %v446_v62 = vpop.permute.xlu1 %445  ;;  %v434_v63 = vpop.permute.xlu0 %433 }
 0x2ad   :  { %vm448_vm6 = vcmp.lt.f32.partialorder %v446_v62, %v2127_v53  ;;  %vm449_vm7 = vcmp.eq.f32.partialorder %v446_v62, %v2127_v53  ;;  %vm437_vm9 = vcmp.eq.f32.partialorder %v434_v63, %v2127_v53  ;;  %vm436_vm11 = vcmp.lt.f32.partialorder %v434_v63, %v2127_v53 }
 0x2ae   :  { %vm451_vm10 = vmand %vm449_vm7, %vm450_vm5 }
 0x2af   :  { %vm452_vm12 = vmor %vm448_vm6, %vm451_vm10  ;;  %vm426_vm10 = vcmask 785408  }
 0x2b0   :  { %vm439_vm13 = vmand %vm437_vm9, %vm438_vm8  ;;  %v1760_v1 = vsel %vm452_vm12, 1.0, %v2196_v8  ;;  %v419_v33 = vpop.permute.xlu0 %418  ;;  %vm1702_vm12 = vcmask 254976  }
 0x2b1   :  { %vm440_vm15 = vmor %vm436_vm11, %vm439_vm13  ;;  %v458_v0 = vpop.permute.xlu1 %457  ;;  %vm2805_vm11 = vcmask 523264  }
 0x2b2   :  { %vm460_vm1 = vcmp.lt.f32.partialorder %v458_v0, %v2127_v53  ;;  %vm461_vm3 = vcmp.eq.f32.partialorder %v458_v0, %v2127_v53  ;;  %v1759_v3 = vsel %vm440_vm15, 1.0, %v2196_v8 }
 0x2b3   :  { %vm463_vm2 = vmand %vm461_vm3, %vm462_vm14  ;;  %v455_v9 = vadd.f32 %v1760_v1, %v1759_v3 }
 0x2b4   :  { %vm464_vm0 = vmor %vm460_vm1, %vm463_vm2  ;;  %vm2803_vm2 = vcmask 261120  }
 0x2b5   :  { %v1761_v4 = vsel %vm464_vm0, 1.0, %v2196_v8  ;;  %vm2802_vm0 = vcmask 31744   ;;  %vm2806_vm13 = vmmov %vm2803_vm2 }
 0x2b6   :  { %v470_v6 = vpop.permute.xlu1 %469  ;;  %v467_v10 = vadd.f32 %v1761_v4, %v455_v9  ;;  %vm2807_vm14 = vmmov %vm2803_vm2 }
 0x2b7   :  { %vm472_vm5 = vcmp.lt.f32.partialorder %v470_v6, %v2127_v53  ;;  %vm473_vm7 = vcmp.eq.f32.partialorder %v470_v6, %v2127_v53  ;;  %vm2808_vm15 = vmmov %vm2803_vm2 }
 0x2b8   :  { %vm475_vm6 = vmand %vm473_vm7, %vm474_vm4 }
 0x2b9   :  { %vm476_vm8 = vmor %vm472_vm5, %vm475_vm6 }
 0x2ba   :  { %v1762_v11 = vsel %vm476_vm8, 1.0, %v2196_v8  ;;  %vm2804_vm4 = vmmov %vm2803_vm2  ;;  %v422_v35 = vpop.permute.xlu1 %421  ;;  %vm1293_vm8 = vcmask 130048  }
 0x2bb   :  { %v479_v12 = vadd.f32 %v1762_v11, %v467_v10  ;;  %v424_v34 = vsel %vm2804_vm4, %v2380_v36, %v419_v33  ;;  %v2071_v11 = vld [vmem:[%s2792_s9 + $0x30] ss:$24 sps:$4 sm:$0xff]   ;;  %vm2809_vm1 = vmmov %vm2803_vm2 }
 0x2bc   :  { %v425_v37 = vsel %vm2805_vm11, %v424_v34, %v2376_v32  ;;  %v555_v32 = vshrl.u32 %v429_v60, 7  ;;  %v2555_v33 = vld [vmem:[%s2793_s10 + $0x30] sm:$0xff]   ;;  %v2562_v34 = vld [vmem:[%s2793_s10 + $0x68] sm:$0xff]   ;;  %vm2810_vm3 = vmmov %vm2805_vm11 }
 0x2bd   :  { %vm480_vm9 = vcmp.ge.f32.partialorder %v479_v12, 1.0  ;;  %v427_v39 = vsel %vm426_vm10, %v425_v37, %v422_v35  ;;  %v2073_v12 = vld [vmem:[%s2792_s9 + $0x34] ss:$24 sps:$4 sm:$0xff]   ;;  %v2576_v37 = vld [vmem:[%s2793_s10 + $0x60] sm:$0xff]   ;;  %vm2811_vm5 = vmmov %vm2810_vm3 }
 0x2be   :  { %v1763_v13 = vsel %vm480_vm9, 1.0, %v2196_v8  ;;  %v2049_v8 = vld [vmem:[%s2790_s7 + $0x54] ss:$8 sps:$4 sm:$0xff]   ;;  %v556_v48 = vsub.s32 0, %v555_v32  ;;  %v560_v50 = vsub.s32 1, %v555_v32  ;;  %v2569_v35 = vld [vmem:[%s2793_s10 + $0x28] sm:$0xff]   ;;  %vm2812_vm7 = vmmov %vm2810_vm3 }
 0x2bf   :  { %v483_v15 = vpack.c.bf16 %v1763_v13, %v1763_v13  ;;  %v2074_v13 = vld [vmem:[%s2792_s9 + $0x38] ss:$24 sps:$4 sm:$0xff]   ;;  %vm2813_vm6 = vmmov %vm2810_vm3 }
 0x2c0   :  { %v557_v51 = vrot.slane %v552_v49, %v556_v48  ;;  %v561_v52 = vrot.slane %v552_v49, %v560_v50  ;;  %vm2814_vm9 = vmmov %vm2810_vm3 }
 0x2c1   :  { %1998 = vmatmul.mubr.msk.bf16.vlgmr.msra.gmra.mxu1 %vm2802_vm0, %v483_v15  ;;  %v2082_v15 = vld [vmem:[%s2792_s9 + $0xc] ss:$24 sps:$4 sm:$0xff]   ;;  %vm2815_vm0 = vmmov %vm2810_vm3 }
 0x2c2   :  { %665 = vmatpush1.bf16.msra.mxu1 %v2041_v14  ;;  %1785 = vmatprep.mubr.msk.bf16.mxu1 %vm2803_vm2, %v2310_v7  ;;  %v2050_v7 = vld [vmem:[%s2790_s7 + $0x40] ss:$8 sps:$4 sm:$0xff]   ;;  %v2076_v14 = vld [vmem:[%s2792_s9 + $0x3c] ss:$24 sps:$4 sm:$0xff]   ;;  %vm2816_vm2 = vmmov %vm2815_vm0 }
 0x2c3   :  { %666 = vmatprep.subr.bf16.mxu1 %v2046_v16  ;;  %874 = vmatprep.subr.bf16.mxu0 %v2076_v14  ;;  %v2077_v16 = vld [vmem:[%s2792_s9] ss:$24 sps:$4 sm:$0xff]   ;;  %vm2817_vm4 = vmmov %vm2815_vm0 }
 0x2c4   :  { %875 = vmatpush1.bf16.msra.mxu0 %v2074_v13 }
 0x2c5   :  { %876 = vmatprep.subr.bf16.mxu0 %v2082_v15 }
 0x2c6   :  { %667 = vmatpush1.bf16.msra.mxu1 %v2044_v17  ;;  %v2080_v17 = vld [vmem:[%s2792_s9 + $0x8] ss:$24 sps:$4 sm:$0xff]  }
 0x2c7   :  { %668 = vmatprep.subr.bf16.mxu1 %v2049_v8 }
 0x2c8   :  { %877 = vmatpush1.bf16.msra.mxu0 %v2080_v17 }
 0x2ca   :  { %669 = vmatpush1.bf16.msra.mxu1 %v2047_v18  ;;  %v2085_v18 = vld [vmem:[%s2792_s9 + $0x44] ss:$24 sps:$4 sm:$0xff]  }
 0x2cb   :  { %670 = vmatprep.subr.bf16.mxu1 %v2052_v19  ;;  %915 = vmatprep.subr.bf16.mxu0 %v2085_v18  ;;  %v2105_v18 = vld [vmem:[%s2794_s11 + $0x4] ss:$8 sps:$4 sm:$0xff]  }
 0x2ce   :  { %671 = vmatpush1.bf16.msra.mxu1 %v2050_v7 }
 0x2cf   :  { %672 = vmatprep.subr.bf16.mxu1 %v2055_v20 }
 0x2d2   :  { %673 = vmatpush1.bf16.msra.mxu1 %v2053_v21 }
 0x2d3   :  { %674 = vmatprep.subr.bf16.mxu1 %v2058_v22 }
 0x2d6   :  { %675 = vmatpush1.bf16.msra.mxu1 %v2056_v23 }
 0x2d7   :  { %676 = vmatprep.subr.bf16.mxu1 %v2061_v24 }
 0x2da   :  { %677 = vmatpush1.bf16.msra.mxu1 %v2059_v25  ;;  %v2083_v25 = vld [vmem:[%s2792_s9 + $0x40] ss:$24 sps:$4 sm:$0xff]  }
 0x2db   :  { %678 = vmatprep.subr.bf16.mxu1 %v2064_v26  ;;  %v2088_v26 = vld [vmem:[%s2792_s9 + $0x14] ss:$24 sps:$4 sm:$0xff]  }
 0x2de   :  { %679 = vmatpush1.bf16.msra.mxu1 %v2062_v27 }
 0x2df   :  { %692 = vmatprep.subr.bf16.mxu1 %v2067_v28  ;;  %v2086_v28 = vld [vmem:[%s2792_s9 + $0x10] ss:$24 sps:$4 sm:$0xff]  }
 0x2e2   :  { %693 = vmatpush2.bf16.msra.mxu1 %v2065_v29  ;;  %v2089_v29 = vld [vmem:[%s2793_s10 + $0x78] sm:$0xff]  }
 0x2e3   :  { %694 = vmatprep.subr.bf16.mxu1 %v2070_v30  ;;  %v2543_v30 = vld [vmem:[%s2793_s10 + $0x38] sm:$0xff]  }
 0x2e6   :  { %695 = vmatpush2.bf16.msra.mxu1 %v2068_v31  ;;  %v2548_v31 = vld [vmem:[%s2793_s10 + $0x70] sm:$0xff]  }
 0x2e7   :  { %833 = vmatprep.subr.bf16.mxu1 %v2073_v12 }
 0x2f3   :  { %v412_v38 = vpop.f32.mrf.mxu1 }
 0x2f4   :  { %v428_v40 = vmul.f32 %v427_v39, %v412_v38  ;;  %v2583_v38 = vld [vmem:[%s2793_s10 + $0x20] sm:$0xff]   ;;  %v2590_v39 = vld [vmem:[%s2793_s10 + $0x58] sm:$0xff]  }
 0x2f5   :  { %v1993_v41 = vpop.f32.mrf.mxu1 }
 0x2f6   :  { %v531_v42 = vpack.c.bf16 %v428_v40, %v428_v40  ;;  %v2597_v40 = vld [vmem:[%s2793_s10 + $0x18] sm:$0xff]   ;;  %v2604_v41 = vld [vmem:[%s2793_s10 + $0x50] sm:$0xff]  }
 0x2f7   :  { %v415_v43 = vpop.f32.mrf.mxu1 }
 0x2f8   :  { %697 = vmatmul.mubr.bf16.vlgmr.msra.gmra.mxu1 %v531_v42  ;;  %v2611_v42 = vld [vmem:[%s2793_s10 + $0x10] sm:$0xff]   ;;  %v2618_v43 = vld [vmem:[%s2793_s10 + $0x48] sm:$0xff]  }
 0x2f9   :  { %v1994_v44 = vpop.f32.mrf.mxu1  ;;  %853 = vmatprep.mubr.bf16.mxu1 %v2195_v2  ;;  %834 = vmatpush1.bf16.msra.mxu1 %v2071_v11 }
 0x2fa   :  { %v2625_v44 = vld [vmem:[%s2793_s10 + $0x8] sm:$0xff]  }
 0x381   :  { %v2476_v45 = vpop.f32.mrf.mxu1 }
 0x382   :  { %1704 = vst.msk [vmem:[#allocation4] sm:$0x3] %vm1702_vm12, %v2476_v45 }
 0x383   :  { %v1999_v36 = vpop.f32.mrf.mxu1 }
 0x384   :  { %v2634_v36 = vld [vmem:[%s2793_s10 + $0x40] sm:$0xff]  }
 0x385   :  { %v528_v46 = vpop.f32.mrf.mxu1 }
 0x386   :  { %v2639_v46 = vld [vmem:[%s2793_s10] sm:$0xff]  }
 0x387   :  { %v2000_v47 = vpop.f32.mrf.mxu1 }
 0x3b8   :  { %v698_v53 = vpop.f32.mrf.mxu1 }
 0x3b9   :  { %v699_v54 = vadd.f32 %v698_v53, %v557_v51 }
 0x3ba   :  { %v700_v55 = vpop.f32.mrf.mxu1 }
 0x3bb   :  { %v701_v56 = vadd.f32 %v700_v55, %v561_v52  ;;  %707 = vrot.lane.b32.xlu0 %v699_v54, %s2203_s0 }
 0x3bc   :  { %v702_v57 = vpop.f32.mrf.mxu1 }
 0x3bd   :  { %709 = vrot.lane.b32.xlu1 %v701_v56, %s2203_s0 }
 0x3be   :  { %v703_v58 = vpop.f32.mrf.mxu1 }
 0x3bf   :  { %720 = vrot.lane.b32.xlu0 %v701_v56, %s2201_s5 }
 0x42d   :  { %v708_v59 = vpop.permute.xlu0 %707 }
 0x42f   :  { %v710_v60 = vpop.permute.xlu1 %709 }
 0x430   :  { %v711_v61 = vsel %vm2806_vm13, %v708_v59, %v710_v60 }
 0x431   :  { %v713_v62 = vadd.f32 %v711_v61, %v699_v54  ;;  %v721_v4 = vpop.permute.xlu0 %720 }
 0x433   :  { %v1786_v63 = vmul.f32 -1.442695, %v713_v62 }
 0x435   :  { %2128 = vpow2.f32 %v1786_v63 }
 0x442   :  { %v2129_v0 = vpop.eup %2128 }
 0x443   :  { %v717_v1 = vadd.f32 1.0, %v2129_v0 }
 0x445   :  { %2130 = vrcp.f32 %v717_v1 }
 0x452   :  { %v2131_v3 = vpop.eup %2130 }
 0x453   :  { %v723_v6 = vmul.f32 %v2131_v3, %v721_v4  ;;  %v730_v7 = vsub.f32 1.0, %v2131_v3 }
 0x455   :  { %725 = vrot.lane.b32.xlu1 %v723_v6, %s2198_s2 }
 0x459   :  { %737 = vrot.lane.b32.xlu1 %v2303_v5, %s2203_s0  ;;  %v2079_v5 = vld [vmem:[%s2792_s9 + $0x4] ss:$24 sps:$4 sm:$0xff]  }
 0x45a   :  { %835 = vmatprep.subr.bf16.mxu1 %v2079_v5 }
 0x45b   :  { %836 = vmatpush1.bf16.msra.mxu1 %v2077_v16 }
 0x45c   :  { %1893 = vmatprep.subr.bf16.mxu1 %v2089_v29 }
 0x4c7   :  { %v726_v9 = vpop.permute.xlu1 %725 }
 0x4c8   :  { %v728_v10 = vadd.f32 %v726_v9, %v699_v54 }
 0x4ca   :  { %2132 = vtanh.f32 %v728_v10 }
 0x4cb   :  { %v738_v19 = vpop.permute.xlu1 %737 }
 0x4cc   :  { %v740_v21 = vmul.f32 %v2131_v3, %v738_v19  ;;  %v2107_v19 = vld [vmem:[%s2794_s11] ss:$8 sps:$4 sm:$0xff]  }
 0x4d7   :  { %v2133_v8 = vpop.eup %2132 }
 0x4d8   :  { %732 = vrot.lane.b32.xlu0 %v2133_v8, %s2201_s5 }
 0x54a   :  { %v733_v20 = vpop.permute.xlu0 %732 }
 0x54b   :  { %v735_v22 = vmul.f32 %v733_v20, %v730_v7 }
 0x54d   :  { %v2519_v23 = vadd.f32 %v740_v21, %v735_v22 }
 0x54f   :  { %v742_v24 = vpack.c.bf16 %v2519_v23, %v2519_v23 }
 0x551   :  { %756 = vrot.lane.b32.xlu0 %v742_v24, %s2201_s5 }
 0x5c3   :  { %v757_v27 = vpop.permute.xlu0 %756 }
 0x5c4   :  { %1799 = vmatmul.mubr.msk.bf16.vlgmr.msra.gmra.mxu1 %vm2807_vm14, %v757_v27  ;;  %1800 = vmatmul.mubr.msk.bf16.vlgmr.msra.gmra.mxu0 %vm2808_vm15, %v757_v27 }
 0x5c5   :  { %916 = vmatpush1.bf16.msra.mxu0 %v2083_v25  ;;  %935 = vmatprep.mubr.bf16.mxu0 %v2195_v2 }
 0x5c6   :  { %917 = vmatprep.subr.bf16.mxu0 %v2088_v26  ;;  %1894 = vmatpush3.bf16.msra.mxu1 %v2543_v30 }
 0x5c7   :  { %1895 = vmatprep.subr.bf16.mxu1 %v2548_v31 }
 0x5c9   :  { %918 = vmatpush1.bf16.msra.mxu0 %v2086_v28 }
 0x5ca   :  { %1871 = vmatprep.subr.bf16.mxu0 %v2089_v29  ;;  %1896 = vmatpush3.bf16.msra.mxu1 %v2555_v33 }
 0x5cb   :  { %1897 = vmatprep.subr.bf16.mxu1 %v2562_v34 }
 0x5cc   :  { %1801 = vmatmul.mubr.msk.bf16.vlgmr.msra.gmra.mxu0 %vm2809_vm1, %v757_v27 }
 0x5cd   :  { %1872 = vmatpush3.bf16.msra.mxu0 %v2543_v30 }
 0x5ce   :  { %1873 = vmatprep.subr.bf16.mxu0 %v2548_v31  ;;  %1898 = vmatpush3.bf16.msra.mxu1 %v2569_v35 }
 0x5cf   :  { %1899 = vmatprep.subr.bf16.mxu1 %v2576_v37 }
 0x5d1   :  { %1874 = vmatpush3.bf16.msra.mxu0 %v2555_v33 }
 0x5d2   :  { %1875 = vmatprep.subr.bf16.mxu0 %v2562_v34  ;;  %1900 = vmatpush3.bf16.msra.mxu1 %v2583_v38 }
 0x5d3   :  { %1901 = vmatprep.subr.bf16.mxu1 %v2590_v39 }
 0x5d5   :  { %1876 = vmatpush3.bf16.msra.mxu0 %v2569_v35 }
 0x5d6   :  { %1877 = vmatprep.subr.bf16.mxu0 %v2576_v37  ;;  %1902 = vmatpush3.bf16.msra.mxu1 %v2597_v40 }
 0x5d7   :  { %1903 = vmatprep.subr.bf16.mxu1 %v2604_v41 }
 0x5d9   :  { %1878 = vmatpush3.bf16.msra.mxu0 %v2583_v38 }
 0x5da   :  { %1879 = vmatprep.subr.bf16.mxu0 %v2590_v39  ;;  %1904 = vmatpush3.bf16.msra.mxu1 %v2611_v42 }
 0x5db   :  { %1905 = vmatprep.subr.bf16.mxu1 %v2618_v43 }
 0x5dd   :  { %1880 = vmatpush3.bf16.msra.mxu0 %v2597_v40 }
 0x5de   :  { %1881 = vmatprep.subr.bf16.mxu0 %v2604_v41  ;;  %1906 = vmatpush3.bf16.msra.mxu1 %v2625_v44 }
 0x5df   :  { %1907 = vmatprep.subr.bf16.mxu1 %v2634_v36 }
 0x5e1   :  { %1882 = vmatpush3.bf16.msra.mxu0 %v2611_v42 }
 0x5e2   :  { %1883 = vmatprep.subr.bf16.mxu0 %v2618_v43  ;;  %1908 = vmatpush3.bf16.msra.mxu1 %v2639_v46 }
 0x5e3   :  { %1937 = vmatprep.subr.bf16.mxu1 %v2089_v29 }
 0x5e5   :  { %1884 = vmatpush3.bf16.msra.mxu0 %v2625_v44 }
 0x5e6   :  { %1885 = vmatprep.subr.bf16.mxu0 %v2634_v36 }
 0x5e9   :  { %1886 = vmatpush3.bf16.msra.mxu0 %v2639_v46 }
 0x5ea   :  { %1915 = vmatprep.subr.bf16.mxu0 %v2089_v29 }
 0x684   :  { %v2645_v47 = vpop.f32.mrf.mxu1  ;;  %v896_v32 = vpop.f32.mrf.mxu0 }
 0x685   :  { %945 = vrot.lane.b32.xlu1 %v896_v32, %s2198_s2 }
 0x686   :  { %v857_v48 = vpop.f32.mrf.mxu1  ;;  %v898_v49 = vpop.f32.mrf.mxu0 }
 0x687   :  { %1167 = vrot.lane.b32.xlu0 %v898_v49, %s2198_s2 }
 0x688   :  { %v859_v50 = vpop.f32.mrf.mxu1  ;;  %v900_v51 = vpop.f32.mrf.mxu0 }
 0x68a   :  { %v860_v52 = vpop.f32.mrf.mxu1  ;;  %v901_v53 = vpop.f32.mrf.mxu0 }
 0x68c   :  { %v2649_v54 = vpop.f32.mrf.mxu0 }
 0x68d   :  { %1339 = vrot.lane.b32.xlu1 %v2649_v54, %s2198_s2 }
 0x68e   :  { %v2653_v55 = vpop.f32.mrf.mxu0 }
 0x68f   :  { %1445 = vrot.lane.b32.xlu0 %v2653_v55, %s2198_s2 }
 0x690   :  { %v941_v56 = vpop.f32.mrf.mxu0 }
 0x692   :  { %v942_v57 = vpop.f32.mrf.mxu0 }
 0x6f7   :  { %v946_v58 = vpop.permute.xlu1 %945 }
 0x6f8   :  { %v948_v59 = vsel %vm2810_vm3, %v896_v32, %v946_v58  ;;  %v1121_v60 = vsel %vm2811_vm5, %v946_v58, %v896_v32 }
 0x6f9   :  { %v949_v61 = vmul.f32 %v948_v59, %v2645_v47  ;;  %v950_v62 = vmul.f32 %v948_v59, %v857_v48  ;;  %v1122_v63 = vmul.f32 %v1121_v60, %v2645_v47  ;;  %v1123_v0 = vmul.f32 %v1121_v60, %v857_v48  ;;  %v1168_v1 = vpop.permute.xlu0 %1167 }
 0x6fa   :  { %v1170_v3 = vsel %vm2812_vm7, %v898_v49, %v1168_v1  ;;  %v1215_v4 = vsel %vm2813_vm6, %v1168_v1, %v898_v49 }
 0x6fb   :  { %v951_v6 = vpack.c.bf16 %v949_v61, %v949_v61  ;;  %v952_v9 = vpack.c.bf16 %v950_v62, %v950_v62  ;;  %v1124_v10 = vpack.c.bf16 %v1122_v63, %v1122_v63  ;;  %v1125_v11 = vpack.c.bf16 %v1123_v0, %v1123_v0 }
 0x6fc   :  { %v1172_v12 = vmul.f32 %v1170_v3, %v857_v48  ;;  %v1217_v13 = vmul.f32 %v1215_v4, %v857_v48  ;;  %v1171_v15 = vmul.f32 %v1170_v3, %v2645_v47  ;;  %v1216_v16 = vmul.f32 %v1215_v4, %v2645_v47  ;;  %v2108_v3 = vld [vmem:[%s2795_s12 + $0x78] sm:$0xff]  }
 0x6fd   :  { %1113 = vmatprep.mubr.bf16.mxu0 %v952_v9  ;;  %1158 = vmatprep.mubr.bf16.mxu1 %v1125_v11  ;;  %v2109_v9 = vld [vmem:[%s2795_s12 + $0x38] sm:$0xff]  }
 0x6fe   :  { %v1174_v14 = vpack.c.bf16 %v1172_v12, %v1172_v12  ;;  %v1219_v5 = vpack.c.bf16 %v1217_v13, %v1217_v13  ;;  %1114 = vmatmul.mubr.bf16.vlgmr.msra.gmra.mxu0 %v951_v6  ;;  %1159 = vmatmul.mubr.bf16.vlgmr.msra.gmra.mxu1 %v1124_v10  ;;  %v1173_v17 = vpack.c.bf16 %v1171_v15, %v1171_v15  ;;  %v2110_v12 = vld [vmem:[%s2795_s12 + $0x70] sm:$0xff]   ;;  %v2112_v13 = vld [vmem:[%s2795_s12 + $0x68] sm:$0xff]   ;;  %v2115_v15 = vld [vmem:[%s2795_s12 + $0x20] sm:$0xff]  }
 0x6ff   :  { %1916 = vmatpush3.bf16.msra.mxu0 %v2543_v30  ;;  %1938 = vmatpush3.bf16.msra.mxu1 %v2543_v30  ;;  %v1218_v8 = vpack.c.bf16 %v1216_v16, %v1216_v16  ;;  %v2116_v16 = vld [vmem:[%s2795_s12 + $0x58] sm:$0xff]  }
 0x700   :  { %1207 = vmatprep.mubr.bf16.mxu0 %v1174_v14  ;;  %1252 = vmatprep.mubr.bf16.mxu1 %v1219_v5  ;;  %v2113_v14 = vld [vmem:[%s2795_s12 + $0x28] sm:$0xff]   ;;  %v2114_v5 = vld [vmem:[%s2795_s12 + $0x60] sm:$0xff]  }
 0x701   :  { %1917 = vmatprep.subr.bf16.mxu0 %v2548_v31  ;;  %1939 = vmatprep.subr.bf16.mxu1 %v2548_v31 }
 0x703   :  { %1918 = vmatpush3.bf16.msra.mxu0 %v2555_v33  ;;  %1940 = vmatpush3.bf16.msra.mxu1 %v2555_v33 }
 0x704   :  { %1919 = vmatprep.subr.bf16.mxu0 %v2562_v34  ;;  %1941 = vmatprep.subr.bf16.mxu1 %v2562_v34 }
 0x707   :  { %1920 = vmatpush3.bf16.msra.mxu0 %v2569_v35  ;;  %1942 = vmatpush3.bf16.msra.mxu1 %v2569_v35 }
 0x708   :  { %1921 = vmatprep.subr.bf16.mxu0 %v2576_v37  ;;  %1943 = vmatprep.subr.bf16.mxu1 %v2576_v37 }
 0x70b   :  { %1922 = vmatpush3.bf16.msra.mxu0 %v2583_v38  ;;  %1944 = vmatpush3.bf16.msra.mxu1 %v2583_v38 }
 0x70c   :  { %1923 = vmatprep.subr.bf16.mxu0 %v2590_v39  ;;  %1945 = vmatprep.subr.bf16.mxu1 %v2590_v39 }
 0x70f   :  { %1924 = vmatpush3.bf16.msra.mxu0 %v2597_v40  ;;  %1946 = vmatpush3.bf16.msra.mxu1 %v2597_v40 }
 0x710   :  { %1925 = vmatprep.subr.bf16.mxu0 %v2604_v41  ;;  %1947 = vmatprep.subr.bf16.mxu1 %v2604_v41 }
 0x713   :  { %1926 = vmatpush3.bf16.msra.mxu0 %v2611_v42  ;;  %1948 = vmatpush3.bf16.msra.mxu1 %v2611_v42 }
 0x714   :  { %1927 = vmatprep.subr.bf16.mxu0 %v2618_v43  ;;  %1949 = vmatprep.subr.bf16.mxu1 %v2618_v43 }
 0x717   :  { %1928 = vmatpush3.bf16.msra.mxu0 %v2625_v44  ;;  %1950 = vmatpush3.bf16.msra.mxu1 %v2625_v44 }
 0x718   :  { %1929 = vmatprep.subr.bf16.mxu0 %v2634_v36  ;;  %1951 = vmatprep.subr.bf16.mxu1 %v2634_v36 }
 0x71b   :  { %1930 = vmatpush3.bf16.msra.mxu0 %v2639_v46  ;;  %1952 = vmatpush3.bf16.msra.mxu1 %v2639_v46 }
 0x71c   :  { %1311 = vmatprep.subr.bf16.mxu0 %v2105_v18  ;;  %1366 = vmatprep.subr.bf16.mxu1 %v2105_v18 }
 0x71e   :  { %1208 = vmatmul.mubr.bf16.vlgmr.msra.gmra.mxu0 %v1173_v17  ;;  %1253 = vmatmul.mubr.bf16.vlgmr.msra.gmra.mxu1 %v1218_v8  ;;  %v2117_v17 = vld [vmem:[%s2795_s12 + $0x18] sm:$0xff]   ;;  %v2118_v8 = vld [vmem:[%s2795_s12 + $0x50] sm:$0xff]  }
 0x71f   :  { %1329 = vmatprep.mubr.bf16.mxu0 %v2195_v2  ;;  %1384 = vmatprep.mubr.bf16.mxu1 %v2195_v2 }
 0x720   :  { %1312 = vmatpush1.bf16.msra.mxu0 %v2107_v19  ;;  %1367 = vmatpush1.bf16.msra.mxu1 %v2107_v19 }
 0x721   :  { %1417 = vmatprep.subr.bf16.mxu0 %v2105_v18  ;;  %1472 = vmatprep.subr.bf16.mxu1 %v2105_v18  ;;  %v2119_v18 = vld [vmem:[%s2795_s12 + $0x10] sm:$0xff]  }
 0x7be   :  { %v1887_v7 = vpop.f32.mrf.mxu0  ;;  %v1909_v20 = vpop.f32.mrf.mxu1 }
 0x7c0   :  { %v1888_v21 = vpop.f32.mrf.mxu0  ;;  %v1910_v22 = vpop.f32.mrf.mxu1 }
 0x7c1   :  { %v1889_v28 = vadd.f32 %v1888_v21, %v1887_v7  ;;  %v1911_v29 = vadd.f32 %v1910_v22, %v1909_v20  ;;  %v2121_v7 = vld [vmem:[%s2795_s12 + $0x8] sm:$0xff]   ;;  %v2122_v20 = vld [vmem:[%s2795_s12 + $0x40] sm:$0xff]  }
 0x7c2   :  { %v1890_v24 = vpop.f32.mrf.mxu0  ;;  %v1912_v25 = vpop.f32.mrf.mxu1  ;;  %v2123_v21 = vld [vmem:[%s2795_s12] sm:$0xff]  }
 0x7c3   :  { %v1260_v34 = vmax.f32 %v1889_v28, %v1911_v29  ;;  %v1340_v25 = vpop.permute.xlu1 %1339 }
 0x7c4   :  { %v1891_v26 = vpop.f32.mrf.mxu0  ;;  %v1913_v27 = vpop.f32.mrf.mxu1 }
 0x7de   :  { %v1931_v30 = vpop.f32.mrf.mxu0  ;;  %v1953_v31 = vpop.f32.mrf.mxu1 }
 0x7e0   :  { %v1932_v33 = vpop.f32.mrf.mxu0  ;;  %v1954_v37 = vpop.f32.mrf.mxu1 }
 0x7e1   :  { %v1933_v35 = vadd.f32 %v1932_v33, %v1931_v30  ;;  %v1955_v40 = vadd.f32 %v1954_v37, %v1953_v31  ;;  %v1446_v33 = vpop.permute.xlu0 %1445 }
 0x7e2   :  { %v1934_v38 = vpop.f32.mrf.mxu0  ;;  %v1956_v41 = vpop.f32.mrf.mxu1 }
 0x7e3   :  { %v1261_v39 = vmax.f32 %v1260_v34, %v1933_v35 }
 0x7e4   :  { %v1935_v42 = vpop.f32.mrf.mxu0  ;;  %v1957_v44 = vpop.f32.mrf.mxu1 }
 0x7e5   :  { %v1262_v43 = vmax.f32 %v1261_v39, %v1955_v40  ;;  %v1448_v42 = vsel %vm2816_vm2, %v2653_v55, %v1446_v33 }
 0x7e7   :  { %v1263_v36 = vsub.f32 %v1889_v28, %v1262_v43  ;;  %v1266_v46 = vsub.f32 %v1911_v29, %v1262_v43  ;;  %v1269_v47 = vsub.f32 %v1933_v35, %v1262_v43  ;;  %v1272_v32 = vsub.f32 %v1955_v40, %v1262_v43 }
 0x7e8   :  { %v1342_v28 = vsel %vm2814_vm9, %v2649_v54, %v1340_v25  ;;  %v1393_v29 = vsel %vm2815_vm0, %v1340_v25, %v2649_v54 }
 0x7e9   :  { %v1264_v48 = vmul.f32 1.442695, %v1263_v36  ;;  %v1267_v49 = vmul.f32 1.442695, %v1266_v46  ;;  %v1270_v50 = vmul.f32 1.442695, %v1269_v47 }
 0x7ea   :  { %v1273_v51 = vmul.f32 1.442695, %v1272_v32 }
 0x7eb   :  { %2134 = vpow2.f32 %v1264_v48  ;;  %v1499_v48 = vsel %vm2817_vm4, %v1446_v33, %v2653_v55 }
 0x7ec   :  { %2136 = vpow2.f32 %v1267_v49 }
 0x7ed   :  { %2138 = vpow2.f32 %v1270_v50 }
 0x7ee   :  { %2140 = vpow2.f32 %v1273_v51 }
 0x7f8   :  { %v2135_v52 = vpop.eup %2134 }
 0x7f9   :  { %v2137_v53 = vpop.eup %2136 }
 0x7fa   :  { %v1275_v56 = vadd.f32 %v2137_v53, %v2135_v52  ;;  %v2139_v57 = vpop.eup %2138 }
 0x7fb   :  { %v2141_v59 = vpop.eup %2140 }
 0x7fc   :  { %v1276_v58 = vadd.f32 %v2139_v57, %v1275_v56 }
 0x7fe   :  { %v1277_v60 = vadd.f32 %v2141_v59, %v1276_v58 }
 0x800   :  { %2142 = vrcp.f32 %v1277_v60 }
 0x80d   :  { %v2143_v61 = vpop.eup %2142 }
 0x80e   :  { %v1279_v62 = vmul.f32 %v2143_v61, %v2135_v52  ;;  %v1347_v63 = vmul.f32 %v2143_v61, %v2137_v53  ;;  %v1398_v4 = vmul.f32 %v2143_v61, %v2139_v57  ;;  %v1453_v6 = vmul.f32 %v2143_v61, %v2141_v59 }
 0x810   :  { %v1280_v0 = vpack.c.bf16 %v1279_v62, %v1279_v62  ;;  %v1348_v1 = vpack.c.bf16 %v1347_v63, %v1347_v63  ;;  %v1399_v10 = vpack.c.bf16 %v1398_v4, %v1398_v4  ;;  %v1454_v11 = vpack.c.bf16 %v1453_v6, %v1453_v6 }
 0x812   :  { %1820 = vmatmul.mubr.msk.bf16.vlgmr.msra.gmra.mxu0 %vm1293_vm8, %v1280_v0  ;;  %1821 = vmatmul.mubr.msk.bf16.vlgmr.msra.gmra.mxu1 %vm1293_vm8, %v1348_v1  ;;  %v1824_v0 = vld [vmem:[%s2796_s13] ss:$0 sm:$0xff] }
 0x813   :  { %1418 = vmatpush1.bf16.msra.mxu0 %v2107_v19  ;;  %1473 = vmatpush1.bf16.msra.mxu1 %v2107_v19  ;;  %v2120_v19 = vld [vmem:[%s2795_s12 + $0x48] sm:$0xff]  }
 0x814   :  { %1435 = vmatprep.mubr.bf16.mxu0 %v2195_v2  ;;  %1490 = vmatprep.mubr.bf16.mxu1 %v2195_v2  ;;  %v2111_v2 = vld [vmem:[%s2795_s12 + $0x30] sm:$0xff]  }
 0x815   :  { %1959 = vmatprep.subr.bf16.mxu0 %v2108_v3 }
 0x81a   :  { %1822 = vmatmul.mubr.msk.bf16.vlgmr.msra.gmra.mxu0 %vm1293_vm8, %v1399_v10  ;;  %1823 = vmatmul.mubr.msk.bf16.vlgmr.msra.gmra.mxu1 %vm1293_vm8, %v1454_v11 }
 0x81b   :  { %1960 = vmatpush3.bf16.msra.mxu0 %v2109_v9 }
 0x81c   :  { %1961 = vmatprep.subr.bf16.mxu0 %v2110_v12 }
 0x81f   :  { %1962 = vmatpush3.bf16.msra.mxu0 %v2111_v2 }
 0x820   :  { %1963 = vmatprep.subr.bf16.mxu0 %v2112_v13 }
 0x823   :  { %1964 = vmatpush3.bf16.msra.mxu0 %v2113_v14 }
 0x824   :  { %1965 = vmatprep.subr.bf16.mxu0 %v2114_v5 }
 0x827   :  { %1966 = vmatpush3.bf16.msra.mxu0 %v2115_v15 }
 0x828   :  { %1967 = vmatprep.subr.bf16.mxu0 %v2116_v16 }
 0x82b   :  { %1968 = vmatpush3.bf16.msra.mxu0 %v2117_v17 }
 0x82c   :  { %1969 = vmatprep.subr.bf16.mxu0 %v2118_v8 }
 0x82f   :  { %1970 = vmatpush3.bf16.msra.mxu0 %v2119_v18 }
 0x830   :  { %1971 = vmatprep.subr.bf16.mxu0 %v2120_v19 }
 0x833   :  { %1972 = vmatpush3.bf16.msra.mxu0 %v2121_v7 }
 0x834   :  { %1973 = vmatprep.subr.bf16.mxu0 %v2122_v20 }
 0x837   :  { %1974 = vmatpush3.bf16.msra.mxu0 %v2123_v21 }
 0x8d2   :  { %v1331_v22 = vpop.f32.mrf.mxu0  ;;  %v1386_v24 = vpop.f32.mrf.mxu1 }
 0x8d3   :  { %v1343_v34 = vmul.f32 %v1342_v28, %v1331_v22  ;;  %v1394_v35 = vmul.f32 %v1393_v29, %v1386_v24 }
 0x8d4   :  { %v1333_v26 = vpop.f32.mrf.mxu0  ;;  %v1388_v27 = vpop.f32.mrf.mxu1 }
 0x8d5   :  { %v1344_v39 = vmul.f32 %v1342_v28, %v1333_v26  ;;  %v1395_v40 = vmul.f32 %v1393_v29, %v1388_v27  ;;  %v1396_v44 = vadd.f32 %v1394_v35, %v1343_v34 }
 0x8d6   :  { %v1335_v30 = vpop.f32.mrf.mxu0  ;;  %v1390_v31 = vpop.f32.mrf.mxu1 }
 0x8d7   :  { %v1397_v32 = vadd.f32 %v1395_v40, %v1344_v39 }
 0x8d8   :  { %v1336_v37 = vpop.f32.mrf.mxu0  ;;  %v1391_v38 = vpop.f32.mrf.mxu1 }
 0x8da   :  { %v1437_v41 = vpop.f32.mrf.mxu0  ;;  %v1492_v43 = vpop.f32.mrf.mxu1 }
 0x8db   :  { %v1449_v36 = vmul.f32 %v1448_v42, %v1437_v41  ;;  %v1500_v50 = vmul.f32 %v1499_v48, %v1492_v43 }
 0x8dc   :  { %v1439_v46 = vpop.f32.mrf.mxu0  ;;  %v1494_v47 = vpop.f32.mrf.mxu1 }
 0x8dd   :  { %v1451_v54 = vadd.f32 %v1449_v36, %v1396_v44  ;;  %v1450_v49 = vmul.f32 %v1448_v42, %v1439_v46  ;;  %v1501_v56 = vmul.f32 %v1499_v48, %v1494_v47 }
 0x8de   :  { %v1441_v51 = vpop.f32.mrf.mxu0  ;;  %v1496_v52 = vpop.f32.mrf.mxu1 }
 0x8df   :  { %v1452_v53 = vadd.f32 %v1450_v49, %v1397_v32  ;;  %v1502_v57 = vadd.f32 %v1500_v50, %v1451_v54 }
 0x8e0   :  { %v1442_v58 = vpop.f32.mrf.mxu0  ;;  %v1497_v59 = vpop.f32.mrf.mxu1 }
 0x8e1   :  { %v1503_v60 = vadd.f32 %v1501_v56, %v1452_v53  ;;  %v1504_v62 = vpack.c.bf16 %v1502_v57, %v1502_v57 }
 0x8e3   :  { %v1505_v61 = vpack.c.bf16 %v1503_v60, %v1503_v60 }
 0x8e5   :  { %1673 = vmatprep.mubr.bf16.mxu0 %v1505_v61 }
 0x8e6   :  { %1674 = vmatmul.mubr.bf16.vlgmr.msra.gmra.mxu0 %v1504_v62 }
 0x9a6   :  { %v1975_v63 = vpop.f32.mrf.mxu0 }
 0x9a8   :  { %v1976_v55 = vpop.f32.mrf.mxu0 }
 0x9a9   :  { %v1977_v1 = vadd.f32 %v1976_v55, %v1975_v63 }
 0x9aa   :  { %v1978_v3 = vpop.f32.mrf.mxu0 }
 0x9ab   :  { %v1676_v4 = vadd.f32 %v1977_v1, %v1824_v0 }
 0x9ac   :  { %v1979_v6 = vpop.f32.mrf.mxu0 }
 0x9ad   :  { %2144 = vtanh.f32 %v1676_v4  ;;  %v1841_v10 = vmul.f32 -1.442695, %v1676_v4 }
 0x9af   :  { %2146 = vpow2.f32 %v1841_v10 }
 0x9ba   :  { %v2145_v9 = vpop.eup %2144 }
 0x9bb   :  { %1689 = vrot.lane.b32.xlu1 %v2145_v9, %s2203_s0 }
 0x9bc   :  { %v2147_v11 = vpop.eup %2146 }
 0x9bd   :  { %v1684_v12 = vadd.f32 1.0, %v2147_v11 }
 0x9bf   :  { %2148 = vrcp.f32 %v1684_v12 }
 0x9c0   :  { %2162 = shalt.err (!%p2159_p4)
}
 0x9c1   :  { %1724 = dma.vmem_to_hbm [thread:$0]  %s1722_s25, 32, %s2798_s15, [#allocation5]   ;;  %v1699_v15 = vsub.f32 1.0, %v2476_v45  ;;  %v2150_v8 = vld [vmem:[%s2784_s1] sm:$0x3] }
 0x9c2   :  { %s2205_s0 = smov [#allocation2]  }
 0x9c3   :  { %s1711_s28 = sshll.u32 %s2205_s0, 4  ;;  %v1700_v18 = vmul.f32 %v2150_v8, %v1699_v15  ;;  %s1712_s28 = int_to_ptr.vmem [resolvable:$true] %s1711_s28 }
 0x9c4   :  { %s2171_s15 = scalar_lea.vmem %s1712_s28, 32  ;;  %p2176_p6 = scmp.lt.s32.totalorder %s1712_s28, %s1712_s28 }
 0x9c5   :  { %p2172_p5 = scmp.ne.s32.totalorder %s1712_s28, %s2171_s15  ;;  %p2177_p7 = scmp.lt.s32.totalorder %s2171_s15, %s2171_s15 }
 0x9c7   :  { %p2178_p8 = por %p2177_p7, %p2176_p6 }
 0x9c9   :  { %p2179_p9 = pnand %p2178_p8, %p2172_p5 }
 0x9cc   :  { %v2149_v2 = vpop.eup %2148 }
 0xa2d   :  { %v1690_v13 = vpop.permute.xlu1 %1689 }
 0xa2e   :  { %v1692_v14 = vmul.f32 %v2149_v2, %v1690_v13 }
 0xa30   :  { %v1693_v5 = vadd.f32 %v1692_v14, %v2519_v23 }
 0xa32   :  { %1695 = vrot.lane.b32.xlu0 %v1693_v5, %s2201_s5 }
 0xaa4   :  { %v1696_v16 = vpop.permute.xlu0 %1695 }
 0xaa5   :  { %v1698_v17 = vmul.f32 %v1696_v16, %v2476_v45 }
 0xaa7   :  { %v1701_v19 = vadd.f32 %v1700_v18, %v1698_v17 }
 0xaa9   :  { %1703 = vst.msk [vmem:[#allocation2] sm:$0x3] %vm1702_vm12, %v1701_v19 }
 0xaaa   :  { %2182 = shalt.err (!%p2179_p9)
}
 0xaab   :  { %1714 = dma.vmem_to_hbm [thread:$0]  %s1712_s28, 32, %s2797_s14, [#allocation3]  }
 0xaac   :  { %2191 = dma.done.wait [#allocation3], 32  }
 0xaad   :  { %2192 = vsyncadd [#allocation3], 4294967264 }
 0xaae   :  { %2193 = dma.done.wait [#allocation5], 32  }
 0xaaf   :  { %2194 = vsyncadd [#allocation5], 4294967264 }
 0xab0   :  { %1731 = vsyncpa [#allocation3], 1 }
 0xab1   :  { %1732 = vsyncpa [#allocation5], 1 }

</bundles_post_ra>
